<compile_context>
chip_gen: v7x
topology: tpu7x:2x2x1
jax: 0.10.0
libtpu: 0.0.40
codegen_flags: <defaults>
</compile_context>

<pallas_src>
import functools

import jax
import jax.numpy as jnp
from jax.experimental import pallas as pl
from jax.experimental.pallas import tpu as pltpu


# Tile sizes (fit comfortably inside the 32 MiB default scoped VMEM on every
# generation, incl. v7x's 64 MiB physical VMEM, with double buffering).
TM = 256   # node-row tile (parallel axis)
TK = 512   # aggregation reduction tile over neighbor nodes (arbitrary axis)
TE = 512   # edge tile along the 128-lane axis for the edge-dot kernel

HIDDEN1 = 128
HIDDEN2 = 64
HIDDEN2_PAD = 128  # pad layer-2 output columns 64 -> 128 for unmasked stores


def _round_up(x, m):
    return ((x + m - 1) // m) * m


# ----------------------------------------------------------------------------
# Pallas kernels
# ----------------------------------------------------------------------------
def _gcn_aggregate_kernel(*refs, apply_w, apply_relu):
    """Accumulates A_hat[i, k] @ feat[k] over k; finalize: (@W) + b (+ReLU)."""
    if apply_w:
        a_ref, f_ref, w_ref, b_ref, o_ref, acc_ref = refs
    else:
        a_ref, f_ref, b_ref, o_ref, acc_ref = refs
        w_ref = None

    k = pl.program_id(1)

    @pl.when(k == 0)
    def _():
        acc_ref[...] = jnp.zeros_like(acc_ref)

    acc_ref[...] += jnp.dot(
        a_ref[...], f_ref[...], preferred_element_type=jnp.float32
    )

    @pl.when(k == pl.num_programs(1) - 1)
    def _():
        out = acc_ref[...]
        if apply_w:
            out = jnp.dot(
                out.astype(w_ref.dtype), w_ref[...],
                preferred_element_type=jnp.float32,
            )
        out = out + b_ref[...]          # bias broadcast, f32
        if apply_relu:
            out = jnp.maximum(out, 0.0)
        o_ref[...] = out.astype(o_ref.dtype)


def _row_matmul_kernel(x_ref, w_ref, o_ref):
    """Row-tiled feature transform: o = x @ w (f32 MXU accumulation)."""
    o_ref[...] = jnp.dot(
        x_ref[...], w_ref[...], preferred_element_type=jnp.float32
    ).astype(o_ref.dtype)


def _edge_dot_kernel(xi_ref, xj_ref, o_ref):
    """Per-edge dot product, edges along the lane axis: o[0, e] = sum_d xi*xj."""
    o_ref[...] = jnp.sum(xi_ref[...] * xj_ref[...], axis=0, keepdims=True)


# ----------------------------------------------------------------------------
# Pallas wrappers
# ----------------------------------------------------------------------------
def gcn_aggregate(a_pad, feat, *, w, b, apply_relu, out_dtype):
    """out = [relu]((A_hat @ feat) [@ w] + b), tiled over (rows, reduction)."""
    n_pad = a_pad.shape[0]
    fdim = feat.shape[1]
    hdim = w.shape[1] if w is not None else fdim

    inputs = [a_pad, feat]
    in_specs = [
        pl.BlockSpec((TM, TK), lambda i, k: (i, k)),
        pl.BlockSpec((TK, fdim), lambda i, k: (k, 0)),
    ]
    if w is not None:
        inputs.append(w)
        in_specs.append(pl.BlockSpec((fdim, hdim), lambda i, k: (0, 0)))
    inputs.append(b.reshape(1, hdim).astype(jnp.float32))
    in_specs.append(pl.BlockSpec((1, hdim), lambda i, k: (0, 0)))

    kern = functools.partial(
        _gcn_aggregate_kernel, apply_w=w is not None, apply_relu=apply_relu
    )
    return pl.pallas_call(
        kern,
        out_shape=jax.ShapeDtypeStruct((n_pad, hdim), out_dtype),
        grid=(n_pad // TM, n_pad // TK),
        in_specs=in_specs,
        out_specs=pl.BlockSpec((TM, hdim), lambda i, k: (i, 0)),
        scratch_shapes=[pltpu.VMEM((TM, fdim), jnp.float32)],
        compiler_params=pltpu.CompilerParams(
            dimension_semantics=("parallel", "arbitrary")
        ),
    )(*inputs)


def row_matmul(x, w, *, out_dtype):
    """out = x @ w, tiled over node rows only (contraction dim fits VMEM)."""
    n_pad, fin = x.shape
    hout = w.shape[1]
    return pl.pallas_call(
        _row_matmul_kernel,
        out_shape=jax.ShapeDtypeStruct((n_pad, hout), out_dtype),
        grid=(n_pad // TM,),
        in_specs=[
            pl.BlockSpec((TM, fin), lambda i: (i, 0)),
            pl.BlockSpec((fin, hout), lambda i: (0, 0)),
        ],
        out_specs=pl.BlockSpec((TM, hout), lambda i: (i, 0)),
        compiler_params=pltpu.CompilerParams(
            dimension_semantics=("parallel",)
        ),
    )(x, w)


def edge_dot(x_i, x_j):
    """einsum('ef,ef->e', x_i, x_j) with a lane-dense (D, E_pad) layout."""
    e, d = x_i.shape
    te = TE if e > TE else _round_up(max(e, 1), 128)
    e_pad = _round_up(max(e, 1), te)
    xi_t = jnp.zeros((d, e_pad), jnp.float32).at[:, :e].set(x_i.T)
    xj_t = jnp.zeros((d, e_pad), jnp.float32).at[:, :e].set(x_j.T)
    out = pl.pallas_call(
        _edge_dot_kernel,
        out_shape=jax.ShapeDtypeStruct((1, e_pad), jnp.float32),
        grid=(e_pad // te,),
        in_specs=[
            pl.BlockSpec((d, te), lambda i: (0, i)),
            pl.BlockSpec((d, te), lambda i: (0, i)),
        ],
        out_specs=pl.BlockSpec((1, te), lambda i: (0, i)),
        compiler_params=pltpu.CompilerParams(
            dimension_semantics=("parallel",)
        ),
    )(xi_t, xj_t)
    return out[0, :e]


# ----------------------------------------------------------------------------
# Plain-JAX glue
# ----------------------------------------------------------------------------
def build_norm_adj(edge_index, num_nodes):
    """Dense GCN-normalized adjacency, matching PyG gcn_norm semantics:
    directed scatter-add A[dst, src] += 1 (duplicate edges accumulate),
    self-loops added, D^-1/2 A D^-1/2 with D = in-degree + 1."""
    src = edge_index[0]
    dst = edge_index[1]
    a = jnp.zeros((num_nodes, num_nodes), jnp.float32)
    a = a.at[dst, src].add(1.0)
    a = a + jnp.eye(num_nodes, dtype=jnp.float32)
    deg = jnp.sum(a, axis=1)
    d_inv_sqrt = jnp.where(deg > 0, 1.0 / jnp.sqrt(deg), 0.0)
    return d_inv_sqrt[:, None] * a * d_inv_sqrt[None, :]


def init_params(key, num_features, hidden1=HIDDEN1, hidden2=HIDDEN2):
    k1, k2 = jax.random.split(key)

    def glorot(k, fan_in, fan_out):
        limit = jnp.sqrt(6.0 / (fan_in + fan_out))
        return jax.random.uniform(
            k, (fan_in, fan_out), jnp.float32, minval=-limit, maxval=limit
        )

    return {
        "w1": glorot(k1, num_features, hidden1),
        "b1": jnp.zeros((hidden1,), jnp.float32),
        "w2": glorot(k2, hidden1, hidden2),
        "b2": jnp.zeros((hidden2,), jnp.float32),
    }


def net_forward(params, x, edge_index, pos_edge_index, neg_edge_index):
    n, f = x.shape
    n_pad = _round_up(n, max(TM, TK))  # multiple of both TM and TK

    # Normalized adjacency / features, zero-padded, bf16 for the MXU streams.
    a_hat = build_norm_adj(edge_index, n)
    a_pad = (
        jnp.zeros((n_pad, n_pad), jnp.float32).at[:n, :n].set(a_hat)
    ).astype(jnp.bfloat16)
    x_pad = (
        jnp.zeros((n_pad, f), jnp.float32).at[:n, :].set(x)
    ).astype(jnp.bfloat16)

    w1 = params["w1"].astype(jnp.bfloat16)                        # (F, 128)
    b1 = params["b1"].astype(jnp.float32)                         # (128,)
    w2p = (
        jnp.zeros((HIDDEN1, HIDDEN2_PAD), jnp.float32)
        .at[:, :HIDDEN2].set(params["w2"])
    ).astype(jnp.bfloat16)                                        # (128, 128)
    b2p = (
        jnp.zeros((HIDDEN2_PAD,), jnp.float32).at[:HIDDEN2].set(params["b2"])
    )

    # Layer 1: h1 = relu((A_hat @ X) @ W1 + b1)   (aggregate first: F < 128)
    h1 = gcn_aggregate(
        a_pad, x_pad, w=w1, b=b1, apply_relu=True, out_dtype=jnp.bfloat16
    )
    # Layer 2: h2 = A_hat @ (h1 @ W2) + b2        (transform first: 64 < 128)
    xw2 = row_matmul(h1, w2p, out_dtype=jnp.bfloat16)
    h2 = gcn_aggregate(
        a_pad, xw2, w=None, b=b2p, apply_relu=False, out_dtype=jnp.float32
    )

    # Edge scoring: gather endpoints (glue) + lane-dense dot-product kernel.
    # Padded feature columns of h2 are exactly zero, so they contribute 0.
    total_edge_index = jnp.concatenate([pos_edge_index, neg_edge_index], axis=-1)
    x_j = jnp.take(h2, total_edge_index[0], axis=0)
    x_i = jnp.take(h2, total_edge_index[1], axis=0)
    return edge_dot(x_i, x_j)


if __name__ == "__main__":
    key = jax.random.PRNGKey(0)
    k_x, k_e, k_pos, k_neg, k_params = jax.random.split(key, 5)

    num_nodes = 16
    num_features = 8
    num_graph_edges = 32
    num_pos = 8
    num_neg = 8

    x = jax.random.normal(k_x, (num_nodes, num_features), jnp.float32)
    edge_index = jax.random.randint(
        k_e, (2, num_graph_edges), 0, num_nodes, dtype=jnp.int32
    )
    pos_edge_index = jax.random.randint(
        k_pos, (2, num_pos), 0, num_nodes, dtype=jnp.int32
    )
    neg_edge_index = jax.random.randint(
        k_neg, (2, num_neg), 0, num_nodes, dtype=jnp.int32
    )

    params = init_params(k_params, num_features)

    scores = jax.jit(net_forward)(
        params, x, edge_index, pos_edge_index, neg_edge_index
    )
    jax.block_until_ready(scores)
    assert scores.shape == (num_pos + num_neg,)
    print("KERNEL_OK")
</pallas_src>

<mosaic_0001>
module attributes {stable_mosaic.version = 11 : i64} {
  func.func private @main(%arg0: i32) attributes {dimension_semantics = [#tpu.dimension_semantics<core_parallel>], iteration_bounds = array<i64: 2>, tpu.core_type = #tpu.core_type<sc_scalar_subcore>, window_params = []} {
    return
  }
}

module attributes {stable_mosaic.version = 11 : i64} {
  func.func private @main(%arg0: i32) attributes {dimension_semantics = [#tpu.dimension_semantics<core_parallel>], iteration_bounds = array<i64: 2>, tpu.core_type = #tpu.core_type<sc_scalar_subcore>, window_params = []} {
    return
  }
}

module attributes {stable_mosaic.version = 11 : i64} {
  func.func @_gcn_aggregate_kernel(%arg0: i32, %arg1: i32, %arg2: memref<256x512xbf16, #tpu.memory_space<vmem>>, %arg3: memref<512x128xbf16, #tpu.memory_space<vmem>>, %arg4: memref<1x128xf32, #tpu.memory_space<vmem>>, %arg5: memref<256x128xf32, #tpu.memory_space<vmem>>, %arg6: memref<256x128xf32, #tpu.memory_space<vmem>>) attributes {dimension_semantics = [#tpu.dimension_semantics<parallel>, #tpu.dimension_semantics<arbitrary>], iteration_bounds = array<i64: 2, 1>, scalar_prefetch = 0 : i64, scratch_operands = 1 : i64, tpu.core_type = #tpu.core_type<tc>, window_params = [{transform_indices = @transform_0, window_bounds = array<i64: 256, 512>}, {transform_indices = @transform_1, window_bounds = array<i64: 512, 128>}, {pipeline_mode = #tpu.pipeline_mode<synchronous>, transform_indices = @transform_2, window_bounds = array<i64: 1, 128>}, {transform_indices = @transform_3, window_bounds = array<i64: 256, 128>}]} {
    %c0_i32 = arith.constant 0 : i32
    %0 = arith.cmpi eq, %arg1, %c0_i32 : i32
    %1 = arith.extui %0 : i1 to i32
    %c0_i32_0 = arith.constant 0 : i32
    %2 = arith.cmpi ne, %1, %c0_i32_0 : i32
    scf.if %2 {
      %cst_10 = arith.constant 0.000000e+00 : f32
      %12 = vector.broadcast %cst_10 : f32 to vector<256x128xf32>
      %c0_11 = arith.constant 0 : index
      %c0_12 = arith.constant 0 : index
      %13 = vector.load %arg6[%c0_11, %c0_12] : memref<256x128xf32, #tpu.memory_space<vmem>>, vector<256x128xf32>
      tpu.vector_store %arg6[%c0_11, %c0_12], %12 {strides = array<i32>} : memref<256x128xf32, #tpu.memory_space<vmem>>, vector<256x128xf32>,
    } else {
    }
    %c0 = arith.constant 0 : index
    %c0_1 = arith.constant 0 : index
    %3 = vector.load %arg6[%c0, %c0_1] : memref<256x128xf32, #tpu.memory_space<vmem>>, vector<256x128xf32>
    %c0_2 = arith.constant 0 : index
    %c0_3 = arith.constant 0 : index
    %4 = vector.load %arg2[%c0_2, %c0_3] : memref<256x512xbf16, #tpu.memory_space<vmem>>, vector<256x512xbf16>
    %c0_4 = arith.constant 0 : index
    %c0_5 = arith.constant 0 : index
    %5 = vector.load %arg3[%c0_4, %c0_5] : memref<512x128xbf16, #tpu.memory_space<vmem>>, vector<512x128xbf16>
    %cst = arith.constant dense<0.000000e+00> : vector<256x128xf32>
    %6 = tpu.matmul %4, %5, %cst {dimension_numbers = #tpu.dot_dimension_numbers<[1], [0], [0], [1], [0, 0, 1, 1], [], []>} : vector<256x512xbf16>, vector<512x128xbf16>, vector<256x128xf32> -> vector<256x128xf32>
    %7 = arith.addf %3, %6 : vector<256x128xf32>
    %c0_6 = arith.constant 0 : index
    %c0_7 = arith.constant 0 : index
    %8 = vector.load %arg6[%c0_6, %c0_7] : memref<256x128xf32, #tpu.memory_space<vmem>>, vector<256x128xf32>
    tpu.vector_store %arg6[%c0_6, %c0_7], %7 {strides = array<i32>} : memref<256x128xf32, #tpu.memory_space<vmem>>, vector<256x128xf32>,
    %c0_i32_8 = arith.constant 0 : i32
    %9 = arith.cmpi eq, %arg1, %c0_i32_8 : i32
    %10 = arith.extui %9 : i1 to i32
    %c0_i32_9 = arith.constant 0 : i32
    %11 = arith.cmpi ne, %10, %c0_i32_9 : i32
    scf.if %11 {
      %c0_10 = arith.constant 0 : index
      %c0_11 = arith.constant 0 : index
      %12 = vector.load %arg6[%c0_10, %c0_11] : memref<256x128xf32, #tpu.memory_space<vmem>>, vector<256x128xf32>
      %c0_12 = arith.constant 0 : index
      %c0_13 = arith.constant 0 : index
      %13 = vector.load %arg4[%c0_12, %c0_13] : memref<1x128xf32, #tpu.memory_space<vmem>>, vector<1x128xf32>
      %14 = vector.broadcast %13 : vector<1x128xf32> to vector<256x128xf32>
      %15 = arith.addf %12, %14 : vector<256x128xf32>
      %c0_14 = arith.constant 0 : index
      %c0_15 = arith.constant 0 : index
      %16 = vector.load %arg5[%c0_14, %c0_15] : memref<256x128xf32, #tpu.memory_space<vmem>>, vector<256x128xf32>
      tpu.vector_store %arg5[%c0_14, %c0_15], %15 {strides = array<i32>} : memref<256x128xf32, #tpu.memory_space<vmem>>, vector<256x128xf32>,
    } else {
    }
    return
  }
  func.func @transform_0(%arg0: i32, %arg1: i32) -> (i32, i32) {
    %c0_i32 = arith.constant 0 : i32
    return %arg0, %arg1 : i32, i32
  }
  func.func @transform_1(%arg0: i32, %arg1: i32) -> (i32, i32) {
    %c0_i32 = arith.constant 0 : i32
    %c0_i32_0 = arith.constant 0 : i32
    return %arg1, %c0_i32 : i32, i32
  }
  func.func @transform_2(%arg0: i32, %arg1: i32) -> (i32, i32) {
    %c0_i32 = arith.constant 0 : i32
    %c0_i32_0 = arith.constant 0 : i32
    %c0_i32_1 = arith.constant 0 : i32
    return %c0_i32, %c0_i32_0 : i32, i32
  }
  func.func @transform_3(%arg0: i32, %arg1: i32) -> (i32, i32) {
    %c0_i32 = arith.constant 0 : i32
    %c0_i32_0 = arith.constant 0 : i32
    return %arg0, %c0_i32 : i32, i32
  }
}

module attributes {stable_mosaic.version = 11 : i64} {
  func.func @_row_matmul_kernel(%arg0: i32, %arg1: memref<256x128xbf16, #tpu.memory_space<vmem>>, %arg2: memref<128x128xbf16, #tpu.memory_space<vmem>>, %arg3: memref<256x128xbf16, #tpu.memory_space<vmem>>) attributes {dimension_semantics = [#tpu.dimension_semantics<parallel>], iteration_bounds = array<i64: 2>, scalar_prefetch = 0 : i64, scratch_operands = 0 : i64, tpu.core_type = #tpu.core_type<tc>, window_params = [{transform_indices = @transform_0, window_bounds = array<i64: 256, 128>}, {pipeline_mode = #tpu.pipeline_mode<synchronous>, transform_indices = @transform_1, window_bounds = array<i64: 128, 128>}, {transform_indices = @transform_2, window_bounds = array<i64: 256, 128>}]} {
    %c0 = arith.constant 0 : index
    %c0_0 = arith.constant 0 : index
    %0 = vector.load %arg1[%c0, %c0_0] : memref<256x128xbf16, #tpu.memory_space<vmem>>, vector<256x128xbf16>
    %c0_1 = arith.constant 0 : index
    %c0_2 = arith.constant 0 : index
    %1 = vector.load %arg2[%c0_1, %c0_2] : memref<128x128xbf16, #tpu.memory_space<vmem>>, vector<128x128xbf16>
    %cst = arith.constant dense<0.000000e+00> : vector<256x128xf32>
    %2 = tpu.matmul %0, %1, %cst {dimension_numbers = #tpu.dot_dimension_numbers<[1], [0], [0], [1], [0, 0, 1, 1], [], []>} : vector<256x128xbf16>, vector<128x128xbf16>, vector<256x128xf32> -> vector<256x128xf32>
    %3 = arith.truncf %2 : vector<256x128xf32> to vector<256x128xbf16>
    %c0_3 = arith.constant 0 : index
    %c0_4 = arith.constant 0 : index
    %4 = vector.load %arg3[%c0_3, %c0_4] : memref<256x128xbf16, #tpu.memory_space<vmem>>, vector<256x128xbf16>
    tpu.vector_store %arg3[%c0_3, %c0_4], %3 {strides = array<i32>} : memref<256x128xbf16, #tpu.memory_space<vmem>>, vector<256x128xbf16>,
    return
  }
  func.func @transform_0(%arg0: i32) -> (i32, i32) {
    %c0_i32 = arith.constant 0 : i32
    %c0_i32_0 = arith.constant 0 : i32
    return %arg0, %c0_i32 : i32, i32
  }
  func.func @transform_1(%arg0: i32) -> (i32, i32) {
    %c0_i32 = arith.constant 0 : i32
    %c0_i32_0 = arith.constant 0 : i32
    %c0_i32_1 = arith.constant 0 : i32
    return %c0_i32, %c0_i32_0 : i32, i32
  }
  func.func @transform_2(%arg0: i32) -> (i32, i32) {
    %c0_i32 = arith.constant 0 : i32
    %c0_i32_0 = arith.constant 0 : i32
    return %arg0, %c0_i32 : i32, i32
  }
}

module attributes {stable_mosaic.version = 11 : i64} {
  func.func @_gcn_aggregate_kernel(%arg0: i32, %arg1: i32, %arg2: memref<256x512xbf16, #tpu.memory_space<vmem>>, %arg3: memref<512x8xbf16, #tpu.memory_space<vmem>>, %arg4: memref<8x128xbf16, #tpu.memory_space<vmem>>, %arg5: memref<1x128xf32, #tpu.memory_space<vmem>>, %arg6: memref<256x128xbf16, #tpu.memory_space<vmem>>, %arg7: memref<256x8xf32, #tpu.memory_space<vmem>>) attributes {dimension_semantics = [#tpu.dimension_semantics<parallel>, #tpu.dimension_semantics<arbitrary>], iteration_bounds = array<i64: 2, 1>, scalar_prefetch = 0 : i64, scratch_operands = 1 : i64, tpu.core_type = #tpu.core_type<tc>, window_params = [{transform_indices = @transform_0, window_bounds = array<i64: 256, 512>}, {transform_indices = @transform_1, window_bounds = array<i64: 512, 8>}, {pipeline_mode = #tpu.pipeline_mode<synchronous>, transform_indices = @transform_2, window_bounds = array<i64: 8, 128>}, {pipeline_mode = #tpu.pipeline_mode<synchronous>, transform_indices = @transform_3, window_bounds = array<i64: 1, 128>}, {transform_indices = @transform_4, window_bounds = array<i64: 256, 128>}]} {
    %c0_i32 = arith.constant 0 : i32
    %0 = arith.cmpi eq, %arg1, %c0_i32 : i32
    %1 = arith.extui %0 : i1 to i32
    %c0_i32_0 = arith.constant 0 : i32
    %2 = arith.cmpi ne, %1, %c0_i32_0 : i32
    scf.if %2 {
      %cst_10 = arith.constant 0.000000e+00 : f32
      %12 = vector.broadcast %cst_10 : f32 to vector<256x8xf32>
      %c0_11 = arith.constant 0 : index
      %c0_12 = arith.constant 0 : index
      %13 = vector.load %arg7[%c0_11, %c0_12] : memref<256x8xf32, #tpu.memory_space<vmem>>, vector<256x8xf32>
      tpu.vector_store %arg7[%c0_11, %c0_12], %12 {strides = array<i32>} : memref<256x8xf32, #tpu.memory_space<vmem>>, vector<256x8xf32>,
    } else {
    }
    %c0 = arith.constant 0 : index
    %c0_1 = arith.constant 0 : index
    %3 = vector.load %arg7[%c0, %c0_1] : memref<256x8xf32, #tpu.memory_space<vmem>>, vector<256x8xf32>
    %c0_2 = arith.constant 0 : index
    %c0_3 = arith.constant 0 : index
    %4 = vector.load %arg2[%c0_2, %c0_3] : memref<256x512xbf16, #tpu.memory_space<vmem>>, vector<256x512xbf16>
    %c0_4 = arith.constant 0 : index
    %c0_5 = arith.constant 0 : index
    %5 = vector.load %arg3[%c0_4, %c0_5] : memref<512x8xbf16, #tpu.memory_space<vmem>>, vector<512x8xbf16>
    %cst = arith.constant dense<0.000000e+00> : vector<256x8xf32>
    %6 = tpu.matmul %4, %5, %cst {dimension_numbers = #tpu.dot_dimension_numbers<[1], [0], [0], [1], [0, 0, 1, 1], [], []>} : vector<256x512xbf16>, vector<512x8xbf16>, vector<256x8xf32> -> vector<256x8xf32>
    %7 = arith.addf %3, %6 : vector<256x8xf32>
    %c0_6 = arith.constant 0 : index
    %c0_7 = arith.constant 0 : index
    %8 = vector.load %arg7[%c0_6, %c0_7] : memref<256x8xf32, #tpu.memory_space<vmem>>, vector<256x8xf32>
    tpu.vector_store %arg7[%c0_6, %c0_7], %7 {strides = array<i32>} : memref<256x8xf32, #tpu.memory_space<vmem>>, vector<256x8xf32>,
    %c0_i32_8 = arith.constant 0 : i32
    %9 = arith.cmpi eq, %arg1, %c0_i32_8 : i32
    %10 = arith.extui %9 : i1 to i32
    %c0_i32_9 = arith.constant 0 : i32
    %11 = arith.cmpi ne, %10, %c0_i32_9 : i32
    scf.if %11 {
      %c0_10 = arith.constant 0 : index
      %c0_11 = arith.constant 0 : index
      %12 = vector.load %arg7[%c0_10, %c0_11] : memref<256x8xf32, #tpu.memory_space<vmem>>, vector<256x8xf32>
      %13 = arith.truncf %12 : vector<256x8xf32> to vector<256x8xbf16>
      %c0_12 = arith.constant 0 : index
      %c0_13 = arith.constant 0 : index
      %14 = vector.load %arg4[%c0_12, %c0_13] : memref<8x128xbf16, #tpu.memory_space<vmem>>, vector<8x128xbf16>
      %cst_14 = arith.constant dense<0.000000e+00> : vector<256x128xf32>
      %15 = tpu.matmul %13, %14, %cst_14 {dimension_numbers = #tpu.dot_dimension_numbers<[1], [0], [0], [1], [0, 0, 1, 1], [], []>} : vector<256x8xbf16>, vector<8x128xbf16>, vector<256x128xf32> -> vector<256x128xf32>
      %c0_15 = arith.constant 0 : index
      %c0_16 = arith.constant 0 : index
      %16 = vector.load %arg5[%c0_15, %c0_16] : memref<1x128xf32, #tpu.memory_space<vmem>>, vector<1x128xf32>
      %17 = vector.broadcast %16 : vector<1x128xf32> to vector<256x128xf32>
      %18 = arith.addf %15, %17 : vector<256x128xf32>
      %cst_17 = arith.constant 0.000000e+00 : f32
      %19 = vector.broadcast %cst_17 : f32 to vector<256x128xf32>
      %20 = arith.maximumf %18, %19 : vector<256x128xf32>
      %21 = arith.truncf %20 : vector<256x128xf32> to vector<256x128xbf16>
      %c0_18 = arith.constant 0 : index
      %c0_19 = arith.constant 0 : index
      %22 = vector.load %arg6[%c0_18, %c0_19] : memref<256x128xbf16, #tpu.memory_space<vmem>>, vector<256x128xbf16>
      tpu.vector_store %arg6[%c0_18, %c0_19], %21 {strides = array<i32>} : memref<256x128xbf16, #tpu.memory_space<vmem>>, vector<256x128xbf16>,
    } else {
    }
    return
  }
  func.func @transform_0(%arg0: i32, %arg1: i32) -> (i32, i32) {
    %c0_i32 = arith.constant 0 : i32
    return %arg0, %arg1 : i32, i32
  }
  func.func @transform_1(%arg0: i32, %arg1: i32) -> (i32, i32) {
    %c0_i32 = arith.constant 0 : i32
    %c0_i32_0 = arith.constant 0 : i32
    return %arg1, %c0_i32 : i32, i32
  }
  func.func @transform_2(%arg0: i32, %arg1: i32) -> (i32, i32) {
    %c0_i32 = arith.constant 0 : i32
    %c0_i32_0 = arith.constant 0 : i32
    %c0_i32_1 = arith.constant 0 : i32
    return %c0_i32, %c0_i32_0 : i32, i32
  }
  func.func @transform_3(%arg0: i32, %arg1: i32) -> (i32, i32) {
    %c0_i32 = arith.constant 0 : i32
    %c0_i32_0 = arith.constant 0 : i32
    %c0_i32_1 = arith.constant 0 : i32
    return %c0_i32, %c0_i32_0 : i32, i32
  }
  func.func @transform_4(%arg0: i32, %arg1: i32) -> (i32, i32) {
    %c0_i32 = arith.constant 0 : i32
    %c0_i32_0 = arith.constant 0 : i32
    return %arg0, %c0_i32 : i32, i32
  }
}

module attributes {stable_mosaic.version = 11 : i64} {
  func.func @_edge_dot_kernel(%arg0: i32, %arg1: memref<128x128xf32, #tpu.memory_space<vmem>>, %arg2: memref<128x128xf32, #tpu.memory_space<vmem>>, %arg3: memref<1x128xf32, #tpu.memory_space<vmem>>) attributes {dimension_semantics = [#tpu.dimension_semantics<parallel>], iteration_bounds = array<i64: 1>, scalar_prefetch = 0 : i64, scratch_operands = 0 : i64, tpu.core_type = #tpu.core_type<tc>, window_params = [{transform_indices = @transform_0, window_bounds = array<i64: 128, 128>}, {transform_indices = @transform_1, window_bounds = array<i64: 128, 128>}, {transform_indices = @transform_2, window_bounds = array<i64: 1, 128>}]} {
    %c0 = arith.constant 0 : index
    %c0_0 = arith.constant 0 : index
    %0 = vector.load %arg1[%c0, %c0_0] : memref<128x128xf32, #tpu.memory_space<vmem>>, vector<128x128xf32>
    %c0_1 = arith.constant 0 : index
    %c0_2 = arith.constant 0 : index
    %1 = vector.load %arg2[%c0_1, %c0_2] : memref<128x128xf32, #tpu.memory_space<vmem>>, vector<128x128xf32>
    %2 = arith.mulf %0, %1 : vector<128x128xf32>
    %cst = arith.constant dense<0.000000e+00> : vector<128xf32>
    %3 = vector.multi_reduction <add>, %2, %cst [0] : vector<128x128xf32> to vector<128xf32>
    %4 = vector.shape_cast %3 : vector<128xf32> to vector<1x128xf32>
    %c0_3 = arith.constant 0 : index
    %c0_4 = arith.constant 0 : index
    %5 = vector.load %arg3[%c0_3, %c0_4] : memref<1x128xf32, #tpu.memory_space<vmem>>, vector<1x128xf32>
    tpu.vector_store %arg3[%c0_3, %c0_4], %4 {strides = array<i32>} : memref<1x128xf32, #tpu.memory_space<vmem>>, vector<1x128xf32>,
    return
  }
  func.func @transform_0(%arg0: i32) -> (i32, i32) {
    %c0_i32 = arith.constant 0 : i32
    %c0_i32_0 = arith.constant 0 : i32
    return %c0_i32, %arg0 : i32, i32
  }
  func.func @transform_1(%arg0: i32) -> (i32, i32) {
    %c0_i32 = arith.constant 0 : i32
    %c0_i32_0 = arith.constant 0 : i32
    return %c0_i32, %arg0 : i32, i32
  }
  func.func @transform_2(%arg0: i32) -> (i32, i32) {
    %c0_i32 = arith.constant 0 : i32
    %c0_i32_0 = arith.constant 0 : i32
    return %c0_i32, %arg0 : i32, i32
  }
}

</mosaic_0001>

<bundles_post_ra>
// kernel: net_forward.6
= control target key start
LH: loop header
LB: loop body
LE: loop exit
PB: predicated region body
PF: predicated region fallthrough
CT: control target
= control target key end

     0   :  { %s2045_s12 = smov 0   ;;  %s2047_s13 = smov 0   ;;  %s2318_s0 = inlined_call_operand.vmem [shape: bf16[512,512], index: 0, kind: input, shape index: {}]   ;;  %s2319_s1 = inlined_call_operand.vmem [shape: bf16[512,128], index: 1, kind: input, shape index: {}]   ;;  %s2320_s2 = inlined_call_operand.vmem [shape: f32[1,128], index: 2, kind: input, shape index: {}]   ;;  %s2321_s3 = inlined_call_operand.vmem [shape: f32[512,128], index: 3, kind: output, shape index: {}]  }
   0x1   :  { %s2049_s14 = smov 0  }
   0x2 LB: > { %s25_s15 = sadd.s32 1, %s2019_s13  ;;  %p1519_p0 = scmp.ge.s32.totalorder %s2023_s14, 1  ;;  %s2023_s14 = sphi %s2049_s14, %s13_s14   ;;  %s2019_s13 = sphi %s2047_s13, %s2323_s13   ;;  %s2015_s12 = sphi %s2045_s12, %s2322_s12  }
   0x3   : > { %p27_p1 = scmp.ge.s32.totalorder %s25_s15, 2  ;;  %p169_p2 = scmp.lt.s32.totalorder %s2023_s14, 3 }
   0x5   : > { %s2325_s15 = smov (%p27_p1, %s25_s15), 0  ;;  %p170_p3 = pnand %p1519_p0, %p169_p2 }
   0x6   : > { %v1873_v0 = vld [vmem:[%s2319_s1 + $0x40] sm:$0xff] (!%p170_p3)   ;;  %v1877_v4 = vld [vmem:[%s2319_s1 + $0x48] sm:$0xff] (!%p170_p3)   ;;  %v1881_v8 = vld [vmem:[%s2319_s1 + $0x50] sm:$0xff] (!%p170_p3)   ;;  %s1520_s25 = sshll.u32 (!%p170_p3), %s2015_s12, 5 }
   0x7   : > { %173 = sbr.rel (%p170_p3) target bundleno = 383 (0x17f), region = 32  ;;  %v1874_v1 = vld [vmem:[%s2319_s1 + $0xc0] sm:$0xff] (!%p170_p3)   ;;  %1625 = vmatprep.subr.bf16.mxu0 (!%p170_p3), %v1873_v0  ;;  %v1878_v5 = vld [vmem:[%s2319_s1 + $0xc8] sm:$0xff] (!%p170_p3)   ;;  %v1882_v9 = vld [vmem:[%s2319_s1 + $0xd0] sm:$0xff] (!%p170_p3)   ;;  %p205_p4 = scmp.lt.s32.totalorder (!%p170_p3), %s1520_s25, 63 }
   0x8   : > { %v1875_v2 = vld [vmem:[%s2319_s1] sm:$0xff] (!%p170_p3)   ;;  %1737 = vmatprep.subr.bf16.mxu1 (!%p170_p3), %v1874_v1  ;;  %v1879_v6 = vld [vmem:[%s2319_s1 + $0x8] sm:$0xff] (!%p170_p3)   ;;  %v1883_v10 = vld [vmem:[%s2319_s1 + $0x10] sm:$0xff] (!%p170_p3)  }
   0x9   : > { %v1876_v3 = vld [vmem:[%s2319_s1 + $0x80] sm:$0xff] (!%p170_p3)   ;;  %1626 = vmatpush3.bf16.msra.mxu0 (!%p170_p3), %v1875_v2  ;;  %v1880_v7 = vld [vmem:[%s2319_s1 + $0x88] sm:$0xff] (!%p170_p3)   ;;  %v1884_v11 = vld [vmem:[%s2319_s1 + $0x90] sm:$0xff] (!%p170_p3)  }
   0xa   : > { %1738 = vmatpush3.bf16.msra.mxu1 (!%p170_p3), %v1876_v3  ;;  %1627 = vmatprep.subr.bf16.mxu0 (!%p170_p3), %v1877_v4  ;;  %v1885_v12 = vld [vmem:[%s2319_s1 + $0x58] sm:$0xff] (!%p170_p3)   ;;  %v1889_v16 = vld [vmem:[%s2319_s1 + $0x60] sm:$0xff] (!%p170_p3)   ;;  %v1893_v20 = vld [vmem:[%s2319_s1 + $0x68] sm:$0xff] (!%p170_p3)  }
   0xb   : > { %1739 = vmatprep.subr.bf16.mxu1 (!%p170_p3), %v1878_v5  ;;  %v1886_v13 = vld [vmem:[%s2319_s1 + $0xd8] sm:$0xff] (!%p170_p3)   ;;  %v1890_v17 = vld [vmem:[%s2319_s1 + $0xe0] sm:$0xff] (!%p170_p3)   ;;  %v1894_v21 = vld [vmem:[%s2319_s1 + $0xe8] sm:$0xff] (!%p170_p3)  }
   0xc   : > { %v1887_v14 = vld [vmem:[%s2319_s1 + $0x18] sm:$0xff] (!%p170_p3)   ;;  %v1891_v18 = vld [vmem:[%s2319_s1 + $0x20] sm:$0xff] (!%p170_p3)   ;;  %v1895_v22 = vld [vmem:[%s2319_s1 + $0x28] sm:$0xff] (!%p170_p3)  }
   0xd   : > { %1628 = vmatpush3.bf16.msra.mxu0 (!%p170_p3), %v1879_v6  ;;  %v1888_v15 = vld [vmem:[%s2319_s1 + $0x98] sm:$0xff] (!%p170_p3)   ;;  %v1892_v19 = vld [vmem:[%s2319_s1 + $0xa0] sm:$0xff] (!%p170_p3)   ;;  %v1896_v23 = vld [vmem:[%s2319_s1 + $0xa8] sm:$0xff] (!%p170_p3)  }
   0xe   : > { %1740 = vmatpush3.bf16.msra.mxu1 %v1880_v7  ;;  %1629 = vmatprep.subr.bf16.mxu0 %v1881_v8  ;;  %s2327_s25 = smov (!%p205_p4, %s1520_s25), 63  ;;  %v1897_v24 = vld [vmem:[%s2319_s1 + $0x70] sm:$0xff]   ;;  %v1901_v28 = vld [vmem:[%s2319_s1 + $0x78] sm:$0xff]  }
   0xf   : > { %1741 = vmatprep.subr.bf16.mxu1 %v1882_v9  ;;  %v1898_v25 = vld [vmem:[%s2319_s1 + $0xf0] sm:$0xff]   ;;  %s1624_s24 = sshll.u32 %s2327_s25, 4  ;;  %v1902_v29 = vld [vmem:[%s2319_s1 + $0xf8] sm:$0xff]   ;;  %s1524_s11 = sshll.u32 %s2327_s25, 3 }
  0x10   : > { %v1899_v26 = vld [vmem:[%s2319_s1 + $0x30] sm:$0xff]   ;;  %s2162_s12 = scalar_lea.vmem %s2318_s0, %s1624_s24  ;;  %v1903_v30 = vld [vmem:[%s2319_s1 + $0x38] sm:$0xff]   ;;  %s2243_s20 = scalar_lea.vmem %s2321_s3, %s1524_s11 }
  0x11   : > { %1630 = vmatpush3.bf16.msra.mxu0 %v1883_v10  ;;  %v1900_v27 = vld [vmem:[%s2319_s1 + $0xb0] sm:$0xff]   ;;  %v1904_v31 = vld [vmem:[%s2319_s1 + $0xb8] sm:$0xff]  }
  0x12   : > { %1742 = vmatpush3.bf16.msra.mxu1 %v1884_v11  ;;  %1631 = vmatprep.subr.bf16.mxu0 %v1885_v12  ;;  %v1905_v32 = vld [vmem:[%s2162_s12] ss:$16 sps:$4 sm:$0xff]   ;;  %v1907_v33 = vld [vmem:[%s2162_s12 + $0x4] ss:$16 sps:$4 sm:$0xff]   ;;  %v1908_v34 = vld [vmem:[%s2162_s12 + $0x8] ss:$16 sps:$4 sm:$0xff]  }
  0x13   : > { %1743 = vmatprep.subr.bf16.mxu1 %v1886_v13  ;;  %v1910_v35 = vld [vmem:[%s2162_s12 + $0xc] ss:$16 sps:$4 sm:$0xff]   ;;  %968 = vmatprep.mubr.bf16.mxu0 %v1907_v33  ;;  %v1911_v36 = vld [vmem:[%s2162_s12 + $0x24] ss:$16 sps:$4 sm:$0xff]   ;;  %v1915_v38 = vld [vmem:[%s2162_s12 + $0x20] ss:$16 sps:$4 sm:$0xff]  }
  0x14   : > { %1129 = vmatprep.mubr.bf16.mxu1 %v1910_v35  ;;  %v1913_v37 = vld [vmem:[%s2162_s12 + $0x2c] ss:$16 sps:$4 sm:$0xff]   ;;  %v1916_v39 = vld [vmem:[%s2162_s12 + $0x28] ss:$16 sps:$4 sm:$0xff]   ;;  %v1917_v40 = vld [vmem:[%s2162_s12 + $0x44] ss:$16 sps:$4 sm:$0xff]  }
  0x15   : > { %1632 = vmatpush3.bf16.msra.mxu0 %v1887_v14  ;;  %v1919_v41 = vld [vmem:[%s2162_s12 + $0x4c] ss:$16 sps:$4 sm:$0xff]   ;;  %v1921_v42 = vld [vmem:[%s2162_s12 + $0x40] ss:$16 sps:$4 sm:$0xff]   ;;  %v1922_v43 = vld [vmem:[%s2162_s12 + $0x48] ss:$16 sps:$4 sm:$0xff]  }
  0x16   : > { %1744 = vmatpush3.bf16.msra.mxu1 %v1888_v15  ;;  %1633 = vmatprep.subr.bf16.mxu0 %v1889_v16  ;;  %v1923_v44 = vld [vmem:[%s2162_s12 + $0x64] ss:$16 sps:$4 sm:$0xff]   ;;  %v1925_v45 = vld [vmem:[%s2162_s12 + $0x6c] ss:$16 sps:$4 sm:$0xff]   ;;  %v1927_v46 = vld [vmem:[%s2162_s12 + $0x60] ss:$16 sps:$4 sm:$0xff]  }
  0x17   : > { %1745 = vmatprep.subr.bf16.mxu1 %v1890_v17  ;;  %v1928_v47 = vld [vmem:[%s2162_s12 + $0x68] ss:$16 sps:$4 sm:$0xff]   ;;  %v1929_v48 = vld [vmem:[%s2162_s12 + $0x84] ss:$16 sps:$4 sm:$0xff]   ;;  %v1931_v49 = vld [vmem:[%s2162_s12 + $0x8c] ss:$16 sps:$4 sm:$0xff]  }
  0x18   : > { %v1933_v50 = vld [vmem:[%s2162_s12 + $0x80] ss:$16 sps:$4 sm:$0xff]   ;;  %v1934_v51 = vld [vmem:[%s2162_s12 + $0x88] ss:$16 sps:$4 sm:$0xff]   ;;  %v1935_v52 = vld [vmem:[%s2162_s12 + $0xa4] ss:$16 sps:$4 sm:$0xff]  }
  0x19   : > { %1634 = vmatpush3.bf16.msra.mxu0 %v1891_v18  ;;  %v1937_v53 = vld [vmem:[%s2162_s12 + $0xac] ss:$16 sps:$4 sm:$0xff]   ;;  %v1939_v54 = vld [vmem:[%s2162_s12 + $0xa0] ss:$16 sps:$4 sm:$0xff]   ;;  %v1940_v55 = vld [vmem:[%s2162_s12 + $0xa8] ss:$16 sps:$4 sm:$0xff]  }
  0x1a   : > { %1746 = vmatpush3.bf16.msra.mxu1 %v1892_v19  ;;  %1635 = vmatprep.subr.bf16.mxu0 %v1893_v20  ;;  %v1941_v56 = vld [vmem:[%s2162_s12 + $0xc4] ss:$16 sps:$4 sm:$0xff]   ;;  %v1943_v57 = vld [vmem:[%s2162_s12 + $0xcc] ss:$16 sps:$4 sm:$0xff]   ;;  %v1945_v58 = vld [vmem:[%s2162_s12 + $0xc0] ss:$16 sps:$4 sm:$0xff]  }
  0x1b   : > { %1747 = vmatprep.subr.bf16.mxu1 %v1894_v21  ;;  %v1946_v59 = vld [vmem:[%s2162_s12 + $0xc8] ss:$16 sps:$4 sm:$0xff]   ;;  %v1947_v60 = vld [vmem:[%s2162_s12 + $0xe4] ss:$16 sps:$4 sm:$0xff]   ;;  %v1949_v61 = vld [vmem:[%s2162_s12 + $0xec] ss:$16 sps:$4 sm:$0xff]  }
  0x1c   : > { %v1951_v62 = vld [vmem:[%s2162_s12 + $0xe0] ss:$16 sps:$4 sm:$0xff]   ;;  %v1952_v63 = vld [vmem:[%s2162_s12 + $0xe8] ss:$16 sps:$4 sm:$0xff]   ;;  %v1953_v0 = vld [vmem:[%s2162_s12 + $0x104] ss:$16 sps:$4 sm:$0xff]  }
  0x1d   : > { %1636 = vmatpush3.bf16.msra.mxu0 %v1895_v22  ;;  %v1955_v1 = vld [vmem:[%s2162_s12 + $0x10c] ss:$16 sps:$4 sm:$0xff]   ;;  %v1957_v2 = vld [vmem:[%s2162_s12 + $0x100] ss:$16 sps:$4 sm:$0xff]   ;;  %v1958_v3 = vld [vmem:[%s2162_s12 + $0x108] ss:$16 sps:$4 sm:$0xff]  }
  0x1e   : > { %1748 = vmatpush3.bf16.msra.mxu1 %v1896_v23  ;;  %1637 = vmatprep.subr.bf16.mxu0 %v1897_v24  ;;  %v1959_v4 = vld [vmem:[%s2162_s12 + $0x124] ss:$16 sps:$4 sm:$0xff]   ;;  %v1961_v5 = vld [vmem:[%s2162_s12 + $0x12c] ss:$16 sps:$4 sm:$0xff]   ;;  %v1963_v6 = vld [vmem:[%s2162_s12 + $0x120] ss:$16 sps:$4 sm:$0xff]  }
  0x1f   : > { %1749 = vmatprep.subr.bf16.mxu1 %v1898_v25  ;;  %v1964_v7 = vld [vmem:[%s2162_s12 + $0x128] ss:$16 sps:$4 sm:$0xff]   ;;  %v1965_v8 = vld [vmem:[%s2162_s12 + $0x144] ss:$16 sps:$4 sm:$0xff]   ;;  %v1967_v9 = vld [vmem:[%s2162_s12 + $0x14c] ss:$16 sps:$4 sm:$0xff]  }
  0x20   : > { %v1969_v10 = vld [vmem:[%s2162_s12 + $0x140] ss:$16 sps:$4 sm:$0xff]   ;;  %v1970_v11 = vld [vmem:[%s2162_s12 + $0x148] ss:$16 sps:$4 sm:$0xff]   ;;  %v1971_v12 = vld [vmem:[%s2162_s12 + $0x164] ss:$16 sps:$4 sm:$0xff]  }
  0x21   : > { %1638 = vmatpush3.bf16.msra.mxu0 %v1899_v26  ;;  %v1973_v13 = vld [vmem:[%s2162_s12 + $0x16c] ss:$16 sps:$4 sm:$0xff]   ;;  %v1975_v14 = vld [vmem:[%s2162_s12 + $0x160] ss:$16 sps:$4 sm:$0xff]   ;;  %v1976_v15 = vld [vmem:[%s2162_s12 + $0x168] ss:$16 sps:$4 sm:$0xff]  }
  0x22   : > { %1750 = vmatpush3.bf16.msra.mxu1 %v1900_v27  ;;  %1639 = vmatprep.subr.bf16.mxu0 %v1901_v28  ;;  %v1977_v16 = vld [vmem:[%s2162_s12 + $0x184] ss:$16 sps:$4 sm:$0xff]   ;;  %v1979_v17 = vld [vmem:[%s2162_s12 + $0x18c] ss:$16 sps:$4 sm:$0xff]   ;;  %v1981_v18 = vld [vmem:[%s2162_s12 + $0x180] ss:$16 sps:$4 sm:$0xff]  }
  0x23   : > { %1751 = vmatprep.subr.bf16.mxu1 %v1902_v29  ;;  %v1982_v19 = vld [vmem:[%s2162_s12 + $0x188] ss:$16 sps:$4 sm:$0xff]   ;;  %v1983_v20 = vld [vmem:[%s2162_s12 + $0x1a4] ss:$16 sps:$4 sm:$0xff]   ;;  %v1985_v21 = vld [vmem:[%s2162_s12 + $0x1ac] ss:$16 sps:$4 sm:$0xff]  }
  0x24   : > { %v1987_v22 = vld [vmem:[%s2162_s12 + $0x1a0] ss:$16 sps:$4 sm:$0xff]   ;;  %v1988_v23 = vld [vmem:[%s2162_s12 + $0x1a8] ss:$16 sps:$4 sm:$0xff]   ;;  %v1989_v24 = vld [vmem:[%s2162_s12 + $0x1c4] ss:$16 sps:$4 sm:$0xff]  }
  0x25   : > { %1640 = vmatpush3.bf16.msra.mxu0 %v1903_v30  ;;  %v1991_v25 = vld [vmem:[%s2162_s12 + $0x1cc] ss:$16 sps:$4 sm:$0xff]   ;;  %v1993_v26 = vld [vmem:[%s2162_s12 + $0x1c0] ss:$16 sps:$4 sm:$0xff]   ;;  %v1994_v27 = vld [vmem:[%s2162_s12 + $0x1c8] ss:$16 sps:$4 sm:$0xff]  }
  0x26   : > { %1752 = vmatpush3.bf16.msra.mxu1 %v1904_v31  ;;  %v1995_v28 = vld [vmem:[%s2162_s12 + $0x1e4] ss:$16 sps:$4 sm:$0xff]   ;;  %v1997_v29 = vld [vmem:[%s2162_s12 + $0x1ec] ss:$16 sps:$4 sm:$0xff]   ;;  %v1999_v30 = vld [vmem:[%s2162_s12 + $0x1e0] ss:$16 sps:$4 sm:$0xff]  }
  0x27   : > { %v2000_v31 = vld [vmem:[%s2162_s12 + $0x1e8] ss:$16 sps:$4 sm:$0xff]  }
  0x28   : > { %969 = vmatmul.mubr.bf16.vlgmr.msra.gmra.mrb[0].mxu0 %v1905_v32 }
  0x29   : > { %1130 = vmatmul.mubr.bf16.vlgmr.msra.gmra.mrb[0].mxu1 %v1908_v34  ;;  %976 = vmatprep.mubr.bf16.mxu0 %v1911_v36 }
  0x2a   : > { %1137 = vmatprep.mubr.bf16.mxu1 %v1913_v37 }
  0x30   : > { %977 = vmatmul.mubr.bf16.gmra.mrb[4].mxu0 %v1915_v38 }
  0x31   : > { %1138 = vmatmul.mubr.bf16.gmra.mrb[4].mxu1 %v1916_v39  ;;  %984 = vmatprep.mubr.bf16.mxu0 %v1917_v40 }
  0x32   : > { %1145 = vmatprep.mubr.bf16.mxu1 %v1919_v41  ;;  %v2238_v41 = vld [vmem:[%s2320_s2] ss:$0 sm:$0xff] }
  0x38   : > { %985 = vmatmul.mubr.bf16.gmra.mrb[8].mxu0 %v1921_v42 }
  0x39   : > { %1146 = vmatmul.mubr.bf16.gmra.mrb[8].mxu1 %v1922_v43  ;;  %992 = vmatprep.mubr.bf16.mxu0 %v1923_v44 }
  0x3a   : > { %1153 = vmatprep.mubr.bf16.mxu1 %v1925_v45 }
  0x40   : > { %993 = vmatmul.mubr.bf16.gmra.mrb[12].mxu0 %v1927_v46 }
  0x41   : > { %1154 = vmatmul.mubr.bf16.gmra.mrb[12].mxu1 %v1928_v47  ;;  %1000 = vmatprep.mubr.bf16.mxu0 %v1929_v48 }
  0x42   : > { %1161 = vmatprep.mubr.bf16.mxu1 %v1931_v49 }
  0x48   : > { %1001 = vmatmul.mubr.bf16.gmra.mrb[16].mxu0 %v1933_v50 }
  0x49   : > { %1162 = vmatmul.mubr.bf16.gmra.mrb[16].mxu1 %v1934_v51  ;;  %1008 = vmatprep.mubr.bf16.mxu0 %v1935_v52 }
  0x4a   : > { %1169 = vmatprep.mubr.bf16.mxu1 %v1937_v53 }
  0x50   : > { %1009 = vmatmul.mubr.bf16.gmra.mrb[20].mxu0 %v1939_v54 }
  0x51   : > { %1170 = vmatmul.mubr.bf16.gmra.mrb[20].mxu1 %v1940_v55  ;;  %1016 = vmatprep.mubr.bf16.mxu0 %v1941_v56 }
  0x52   : > { %1177 = vmatprep.mubr.bf16.mxu1 %v1943_v57 }
  0x58   : > { %1017 = vmatmul.mubr.bf16.gmra.mrb[24].mxu0 %v1945_v58 }
  0x59   : > { %1178 = vmatmul.mubr.bf16.gmra.mrb[24].mxu1 %v1946_v59  ;;  %1024 = vmatprep.mubr.bf16.mxu0 %v1947_v60 }
  0x5a   : > { %1185 = vmatprep.mubr.bf16.mxu1 %v1949_v61 }
  0x60   : > { %1025 = vmatmul.mubr.bf16.gmra.mrb[28].mxu0 %v1951_v62 }
  0x61   : > { %1186 = vmatmul.mubr.bf16.gmra.mrb[28].mxu1 %v1952_v63  ;;  %1032 = vmatprep.mubr.bf16.mxu0 %v1953_v0 }
  0x62   : > { %1193 = vmatprep.mubr.bf16.mxu1 %v1955_v1 }
  0x68   : > { %1033 = vmatmul.mubr.bf16.gmra.mrb[32].mxu0 %v1957_v2 }
  0x69   : > { %1194 = vmatmul.mubr.bf16.gmra.mrb[32].mxu1 %v1958_v3  ;;  %1040 = vmatprep.mubr.bf16.mxu0 %v1959_v4 }
  0x6a   : > { %1201 = vmatprep.mubr.bf16.mxu1 %v1961_v5 }
  0x70   : > { %1041 = vmatmul.mubr.bf16.gmra.mrb[36].mxu0 %v1963_v6 }
  0x71   : > { %1202 = vmatmul.mubr.bf16.gmra.mrb[36].mxu1 %v1964_v7  ;;  %1048 = vmatprep.mubr.bf16.mxu0 %v1965_v8 }
  0x72   : > { %1209 = vmatprep.mubr.bf16.mxu1 %v1967_v9 }
  0x78   : > { %1049 = vmatmul.mubr.bf16.gmra.mrb[40].mxu0 %v1969_v10 }
  0x79   : > { %1210 = vmatmul.mubr.bf16.gmra.mrb[40].mxu1 %v1970_v11  ;;  %1056 = vmatprep.mubr.bf16.mxu0 %v1971_v12 }
  0x7a   : > { %1217 = vmatprep.mubr.bf16.mxu1 %v1973_v13 }
  0x80   : > { %1057 = vmatmul.mubr.bf16.gmra.mrb[44].mxu0 %v1975_v14 }
  0x81   : > { %1218 = vmatmul.mubr.bf16.gmra.mrb[44].mxu1 %v1976_v15  ;;  %1064 = vmatprep.mubr.bf16.mxu0 %v1977_v16 }
  0x82   : > { %1225 = vmatprep.mubr.bf16.mxu1 %v1979_v17 }
  0x88   : > { %1065 = vmatmul.mubr.bf16.gmra.mrb[48].mxu0 %v1981_v18 }
  0x89   : > { %1226 = vmatmul.mubr.bf16.gmra.mrb[48].mxu1 %v1982_v19  ;;  %1072 = vmatprep.mubr.bf16.mxu0 %v1983_v20 }
  0x8a   : > { %1233 = vmatprep.mubr.bf16.mxu1 %v1985_v21 }
  0x90   : > { %1073 = vmatmul.mubr.bf16.gmra.mrb[52].mxu0 %v1987_v22 }
  0x91   : > { %1234 = vmatmul.mubr.bf16.gmra.mrb[52].mxu1 %v1988_v23  ;;  %1080 = vmatprep.mubr.bf16.mxu0 %v1989_v24 }
  0x92   : > { %1241 = vmatprep.mubr.bf16.mxu1 %v1991_v25 }
  0x98   : > { %1081 = vmatmul.mubr.bf16.gmra.mrb[56].mxu0 %v1993_v26 }
  0x99   : > { %1242 = vmatmul.mubr.bf16.gmra.mrb[56].mxu1 %v1994_v27  ;;  %1088 = vmatprep.mubr.bf16.mxu0 %v1995_v28 }
  0x9a   : > { %1249 = vmatprep.mubr.bf16.mxu1 %v1997_v29 }
  0xa0   : > { %1089 = vmatmul.mubr.bf16.gmra.mrb[60].mxu0 %v1999_v30 }
  0xa1   : > { %1250 = vmatmul.mubr.bf16.gmra.mrb[60].mxu1 %v2000_v31 }
  0xfb   : > { %v1641_v32 = vpop.f32.mrb[0].mxu0 }
  0xfc   : > { %v1753_v33 = vpop.f32.mrb[0].mxu1  ;;  %v1642_v34 = vpop.f32.mrb[1].mxu0 }
  0xfd   : > { %v1643_v35 = vadd.f32 %v1642_v34, %v1641_v32  ;;  %v1754_v36 = vpop.f32.mrb[1].mxu1  ;;  %v1644_v37 = vpop.f32.mrb[2].mxu0 }
  0xfe   : > { %v1755_v38 = vadd.f32 %v1754_v36, %v1753_v33  ;;  %v1756_v39 = vpop.f32.mrb[2].mxu1  ;;  %v1645_v40 = vpop.f32.mrb[3].mxu0 }
  0xff   : > { %v1646_v42 = vadd.f32 %v1645_v40, %v1644_v37  ;;  %v1757_v43 = vpop.f32.mrb[3].mxu1 }
 0x100   : > { %v1132_v44 = vadd.f32 %v1755_v38, %v1643_v35  ;;  %v1758_v45 = vadd.f32 %v1757_v43, %v1756_v39 }
 0x102   : > { %v1364_v46 = vadd.f32 %v2238_v41, %v1132_v44  ;;  %v1135_v47 = vadd.f32 %v1758_v45, %v1646_v42 }
 0x103   : > { %v1647_v48 = vpop.f32.mrb[4].mxu0 }
 0x104   : > { %1396 = vst [vmem:[%s2243_s20] sm:$0xff] %v1364_v46  ;;  %v1365_v49 = vadd.f32 %v2238_v41, %v1135_v47  ;;  %v1759_v50 = vpop.f32.mrb[4].mxu1  ;;  %v1648_v51 = vpop.f32.mrb[5].mxu0 }
 0x105   : > { %v1649_v52 = vadd.f32 %v1648_v51, %v1647_v48  ;;  %v1760_v53 = vpop.f32.mrb[5].mxu1  ;;  %v1650_v54 = vpop.f32.mrb[6].mxu0 }
 0x106   : > { %1397 = vst [vmem:[%s2243_s20 + $0x8] sm:$0xff] %v1365_v49  ;;  %v1761_v55 = vadd.f32 %v1760_v53, %v1759_v50  ;;  %v1762_v56 = vpop.f32.mrb[6].mxu1  ;;  %v1651_v57 = vpop.f32.mrb[7].mxu0 }
 0x107   : > { %v1652_v58 = vadd.f32 %v1651_v57, %v1650_v54  ;;  %v1763_v59 = vpop.f32.mrb[7].mxu1 }
 0x108   : > { %v1140_v60 = vadd.f32 %v1761_v55, %v1649_v52  ;;  %v1764_v61 = vadd.f32 %v1763_v59, %v1762_v56 }
 0x10a   : > { %v1366_v62 = vadd.f32 %v2238_v41, %v1140_v60  ;;  %v1143_v63 = vadd.f32 %v1764_v61, %v1652_v58 }
 0x10b   : > { %v1653_v0 = vpop.f32.mrb[8].mxu0 }
 0x10c   : > { %1398 = vst [vmem:[%s2243_s20 + $0x10] sm:$0xff] %v1366_v62  ;;  %v1367_v1 = vadd.f32 %v2238_v41, %v1143_v63  ;;  %v1765_v2 = vpop.f32.mrb[8].mxu1  ;;  %v1654_v3 = vpop.f32.mrb[9].mxu0 }
 0x10d   : > { %v1655_v4 = vadd.f32 %v1654_v3, %v1653_v0  ;;  %v1766_v5 = vpop.f32.mrb[9].mxu1  ;;  %v1656_v6 = vpop.f32.mrb[10].mxu0 }
 0x10e   : > { %1399 = vst [vmem:[%s2243_s20 + $0x18] sm:$0xff] %v1367_v1  ;;  %v1767_v7 = vadd.f32 %v1766_v5, %v1765_v2  ;;  %v1768_v8 = vpop.f32.mrb[10].mxu1  ;;  %v1657_v9 = vpop.f32.mrb[11].mxu0 }
 0x10f   : > { %v1658_v10 = vadd.f32 %v1657_v9, %v1656_v6  ;;  %v1769_v11 = vpop.f32.mrb[11].mxu1 }
 0x110   : > { %v1148_v12 = vadd.f32 %v1767_v7, %v1655_v4  ;;  %v1770_v13 = vadd.f32 %v1769_v11, %v1768_v8 }
 0x112   : > { %v1368_v14 = vadd.f32 %v2238_v41, %v1148_v12  ;;  %v1151_v15 = vadd.f32 %v1770_v13, %v1658_v10 }
 0x113   : > { %v1659_v16 = vpop.f32.mrb[12].mxu0 }
 0x114   : > { %1400 = vst [vmem:[%s2243_s20 + $0x20] sm:$0xff] %v1368_v14  ;;  %v1369_v17 = vadd.f32 %v2238_v41, %v1151_v15  ;;  %v1771_v18 = vpop.f32.mrb[12].mxu1  ;;  %v1660_v19 = vpop.f32.mrb[13].mxu0 }
 0x115   : > { %v1661_v20 = vadd.f32 %v1660_v19, %v1659_v16  ;;  %v1772_v21 = vpop.f32.mrb[13].mxu1  ;;  %v1662_v22 = vpop.f32.mrb[14].mxu0 }
 0x116   : > { %1401 = vst [vmem:[%s2243_s20 + $0x28] sm:$0xff] %v1369_v17  ;;  %v1773_v23 = vadd.f32 %v1772_v21, %v1771_v18  ;;  %v1774_v24 = vpop.f32.mrb[14].mxu1  ;;  %v1663_v25 = vpop.f32.mrb[15].mxu0 }
 0x117   : > { %v1664_v26 = vadd.f32 %v1663_v25, %v1662_v22  ;;  %v1775_v27 = vpop.f32.mrb[15].mxu1 }
 0x118   : > { %v1156_v28 = vadd.f32 %v1773_v23, %v1661_v20  ;;  %v1776_v29 = vadd.f32 %v1775_v27, %v1774_v24 }
 0x11a   : > { %v1370_v30 = vadd.f32 %v2238_v41, %v1156_v28  ;;  %v1159_v31 = vadd.f32 %v1776_v29, %v1664_v26 }
 0x11b   : > { %v1665_v32 = vpop.f32.mrb[16].mxu0 }
 0x11c   : > { %1402 = vst [vmem:[%s2243_s20 + $0x30] sm:$0xff] %v1370_v30  ;;  %v1371_v33 = vadd.f32 %v2238_v41, %v1159_v31  ;;  %v1777_v34 = vpop.f32.mrb[16].mxu1  ;;  %v1666_v35 = vpop.f32.mrb[17].mxu0 }
 0x11d   : > { %v1667_v36 = vadd.f32 %v1666_v35, %v1665_v32  ;;  %v1778_v37 = vpop.f32.mrb[17].mxu1  ;;  %v1668_v38 = vpop.f32.mrb[18].mxu0 }
 0x11e   : > { %1403 = vst [vmem:[%s2243_s20 + $0x38] sm:$0xff] %v1371_v33  ;;  %v1779_v39 = vadd.f32 %v1778_v37, %v1777_v34  ;;  %v1780_v40 = vpop.f32.mrb[18].mxu1  ;;  %v1669_v42 = vpop.f32.mrb[19].mxu0 }
 0x11f   : > { %v1670_v43 = vadd.f32 %v1669_v42, %v1668_v38  ;;  %v1781_v44 = vpop.f32.mrb[19].mxu1 }
 0x120   : > { %v1164_v45 = vadd.f32 %v1779_v39, %v1667_v36  ;;  %v1782_v46 = vadd.f32 %v1781_v44, %v1780_v40 }
 0x122   : > { %v1372_v47 = vadd.f32 %v2238_v41, %v1164_v45  ;;  %v1167_v48 = vadd.f32 %v1782_v46, %v1670_v43 }
 0x123   : > { %v1671_v49 = vpop.f32.mrb[20].mxu0 }
 0x124   : > { %1404 = vst [vmem:[%s2243_s20 + $0x40] sm:$0xff] %v1372_v47  ;;  %v1373_v50 = vadd.f32 %v2238_v41, %v1167_v48  ;;  %v1783_v51 = vpop.f32.mrb[20].mxu1  ;;  %v1672_v52 = vpop.f32.mrb[21].mxu0 }
 0x125   : > { %v1673_v53 = vadd.f32 %v1672_v52, %v1671_v49  ;;  %v1784_v54 = vpop.f32.mrb[21].mxu1  ;;  %v1674_v55 = vpop.f32.mrb[22].mxu0 }
 0x126   : > { %1405 = vst [vmem:[%s2243_s20 + $0x48] sm:$0xff] %v1373_v50  ;;  %v1785_v56 = vadd.f32 %v1784_v54, %v1783_v51  ;;  %v1786_v57 = vpop.f32.mrb[22].mxu1  ;;  %v1675_v58 = vpop.f32.mrb[23].mxu0 }
 0x127   : > { %v1676_v59 = vadd.f32 %v1675_v58, %v1674_v55  ;;  %v1787_v60 = vpop.f32.mrb[23].mxu1 }
 0x128   : > { %v1172_v61 = vadd.f32 %v1785_v56, %v1673_v53  ;;  %v1788_v62 = vadd.f32 %v1787_v60, %v1786_v57 }
 0x12a   : > { %v1374_v63 = vadd.f32 %v2238_v41, %v1172_v61  ;;  %v1175_v0 = vadd.f32 %v1788_v62, %v1676_v59 }
 0x12b   : > { %v1677_v1 = vpop.f32.mrb[24].mxu0 }
 0x12c   : > { %1406 = vst [vmem:[%s2243_s20 + $0x50] sm:$0xff] %v1374_v63  ;;  %v1375_v2 = vadd.f32 %v2238_v41, %v1175_v0  ;;  %v1789_v3 = vpop.f32.mrb[24].mxu1  ;;  %v1678_v4 = vpop.f32.mrb[25].mxu0 }
 0x12d   : > { %v1679_v5 = vadd.f32 %v1678_v4, %v1677_v1  ;;  %v1790_v6 = vpop.f32.mrb[25].mxu1  ;;  %v1680_v7 = vpop.f32.mrb[26].mxu0 }
 0x12e   : > { %1407 = vst [vmem:[%s2243_s20 + $0x58] sm:$0xff] %v1375_v2  ;;  %v1791_v8 = vadd.f32 %v1790_v6, %v1789_v3  ;;  %v1792_v9 = vpop.f32.mrb[26].mxu1  ;;  %v1681_v10 = vpop.f32.mrb[27].mxu0 }
 0x12f   : > { %v1682_v11 = vadd.f32 %v1681_v10, %v1680_v7  ;;  %v1793_v12 = vpop.f32.mrb[27].mxu1 }
 0x130   : > { %v1180_v13 = vadd.f32 %v1791_v8, %v1679_v5  ;;  %v1794_v14 = vadd.f32 %v1793_v12, %v1792_v9 }
 0x132   : > { %v1376_v15 = vadd.f32 %v2238_v41, %v1180_v13  ;;  %v1183_v16 = vadd.f32 %v1794_v14, %v1682_v11 }
 0x133   : > { %v1683_v17 = vpop.f32.mrb[28].mxu0 }
 0x134   : > { %1408 = vst [vmem:[%s2243_s20 + $0x60] sm:$0xff] %v1376_v15  ;;  %v1377_v18 = vadd.f32 %v2238_v41, %v1183_v16  ;;  %v1795_v19 = vpop.f32.mrb[28].mxu1  ;;  %v1684_v20 = vpop.f32.mrb[29].mxu0 }
 0x135   : > { %v1685_v21 = vadd.f32 %v1684_v20, %v1683_v17  ;;  %v1796_v22 = vpop.f32.mrb[29].mxu1  ;;  %v1686_v23 = vpop.f32.mrb[30].mxu0 }
 0x136   : > { %1409 = vst [vmem:[%s2243_s20 + $0x68] sm:$0xff] %v1377_v18  ;;  %v1797_v24 = vadd.f32 %v1796_v22, %v1795_v19  ;;  %v1798_v25 = vpop.f32.mrb[30].mxu1  ;;  %v1687_v26 = vpop.f32.mrb[31].mxu0 }
 0x137   : > { %v1688_v27 = vadd.f32 %v1687_v26, %v1686_v23  ;;  %v1799_v28 = vpop.f32.mrb[31].mxu1 }
 0x138   : > { %v1188_v29 = vadd.f32 %v1797_v24, %v1685_v21  ;;  %v1800_v30 = vadd.f32 %v1799_v28, %v1798_v25 }
 0x13a   : > { %v1378_v31 = vadd.f32 %v2238_v41, %v1188_v29  ;;  %v1191_v32 = vadd.f32 %v1800_v30, %v1688_v27 }
 0x13b   : > { %v1689_v33 = vpop.f32.mrb[32].mxu0 }
 0x13c   : > { %1410 = vst [vmem:[%s2243_s20 + $0x70] sm:$0xff] %v1378_v31  ;;  %v1379_v34 = vadd.f32 %v2238_v41, %v1191_v32  ;;  %v1801_v35 = vpop.f32.mrb[32].mxu1  ;;  %v1690_v36 = vpop.f32.mrb[33].mxu0 }
 0x13d   : > { %v1691_v37 = vadd.f32 %v1690_v36, %v1689_v33  ;;  %v1802_v38 = vpop.f32.mrb[33].mxu1  ;;  %v1692_v39 = vpop.f32.mrb[34].mxu0 }
 0x13e   : > { %1411 = vst [vmem:[%s2243_s20 + $0x78] sm:$0xff] %v1379_v34  ;;  %v1803_v40 = vadd.f32 %v1802_v38, %v1801_v35  ;;  %v1804_v42 = vpop.f32.mrb[34].mxu1  ;;  %v1693_v43 = vpop.f32.mrb[35].mxu0 }
 0x13f   : > { %v1694_v44 = vadd.f32 %v1693_v43, %v1692_v39  ;;  %v1805_v45 = vpop.f32.mrb[35].mxu1 }
 0x140   : > { %v1196_v46 = vadd.f32 %v1803_v40, %v1691_v37  ;;  %v1806_v47 = vadd.f32 %v1805_v45, %v1804_v42 }
 0x142   : > { %v1380_v48 = vadd.f32 %v2238_v41, %v1196_v46  ;;  %v1199_v49 = vadd.f32 %v1806_v47, %v1694_v44 }
 0x143   : > { %v1695_v50 = vpop.f32.mrb[36].mxu0 }
 0x144   : > { %1412 = vst [vmem:[%s2243_s20 + $0x80] sm:$0xff] %v1380_v48  ;;  %v1381_v51 = vadd.f32 %v2238_v41, %v1199_v49  ;;  %v1807_v52 = vpop.f32.mrb[36].mxu1  ;;  %v1696_v53 = vpop.f32.mrb[37].mxu0 }
 0x145   : > { %v1697_v54 = vadd.f32 %v1696_v53, %v1695_v50  ;;  %v1808_v55 = vpop.f32.mrb[37].mxu1  ;;  %v1698_v56 = vpop.f32.mrb[38].mxu0 }
 0x146   : > { %1413 = vst [vmem:[%s2243_s20 + $0x88] sm:$0xff] %v1381_v51  ;;  %v1809_v57 = vadd.f32 %v1808_v55, %v1807_v52  ;;  %v1810_v58 = vpop.f32.mrb[38].mxu1  ;;  %v1699_v59 = vpop.f32.mrb[39].mxu0 }
 0x147   : > { %v1700_v60 = vadd.f32 %v1699_v59, %v1698_v56  ;;  %v1811_v61 = vpop.f32.mrb[39].mxu1 }
 0x148   : > { %v1204_v62 = vadd.f32 %v1809_v57, %v1697_v54  ;;  %v1812_v63 = vadd.f32 %v1811_v61, %v1810_v58 }
 0x14a   : > { %v1382_v0 = vadd.f32 %v2238_v41, %v1204_v62  ;;  %v1207_v1 = vadd.f32 %v1812_v63, %v1700_v60 }
 0x14b   : > { %v1701_v2 = vpop.f32.mrb[40].mxu0 }
 0x14c   : > { %1414 = vst [vmem:[%s2243_s20 + $0x90] sm:$0xff] %v1382_v0  ;;  %v1383_v3 = vadd.f32 %v2238_v41, %v1207_v1  ;;  %v1813_v4 = vpop.f32.mrb[40].mxu1  ;;  %v1702_v5 = vpop.f32.mrb[41].mxu0 }
 0x14d   : > { %v1703_v6 = vadd.f32 %v1702_v5, %v1701_v2  ;;  %v1814_v7 = vpop.f32.mrb[41].mxu1  ;;  %v1704_v8 = vpop.f32.mrb[42].mxu0 }
 0x14e   : > { %1415 = vst [vmem:[%s2243_s20 + $0x98] sm:$0xff] %v1383_v3  ;;  %v1815_v9 = vadd.f32 %v1814_v7, %v1813_v4  ;;  %v1816_v10 = vpop.f32.mrb[42].mxu1  ;;  %v1705_v11 = vpop.f32.mrb[43].mxu0 }
 0x14f   : > { %v1706_v12 = vadd.f32 %v1705_v11, %v1704_v8  ;;  %v1817_v13 = vpop.f32.mrb[43].mxu1 }
 0x150   : > { %v1212_v14 = vadd.f32 %v1815_v9, %v1703_v6  ;;  %v1818_v15 = vadd.f32 %v1817_v13, %v1816_v10 }
 0x152   : > { %v1384_v16 = vadd.f32 %v2238_v41, %v1212_v14  ;;  %v1215_v17 = vadd.f32 %v1818_v15, %v1706_v12 }
 0x153   : > { %v1707_v18 = vpop.f32.mrb[44].mxu0 }
 0x154   : > { %1416 = vst [vmem:[%s2243_s20 + $0xa0] sm:$0xff] %v1384_v16  ;;  %v1385_v19 = vadd.f32 %v2238_v41, %v1215_v17  ;;  %v1819_v20 = vpop.f32.mrb[44].mxu1  ;;  %v1708_v21 = vpop.f32.mrb[45].mxu0 }
 0x155   : > { %v1709_v22 = vadd.f32 %v1708_v21, %v1707_v18  ;;  %v1820_v23 = vpop.f32.mrb[45].mxu1  ;;  %v1710_v24 = vpop.f32.mrb[46].mxu0 }
 0x156   : > { %1417 = vst [vmem:[%s2243_s20 + $0xa8] sm:$0xff] %v1385_v19  ;;  %v1821_v25 = vadd.f32 %v1820_v23, %v1819_v20  ;;  %v1822_v26 = vpop.f32.mrb[46].mxu1  ;;  %v1711_v27 = vpop.f32.mrb[47].mxu0 }
 0x157   : > { %v1712_v28 = vadd.f32 %v1711_v27, %v1710_v24  ;;  %v1823_v29 = vpop.f32.mrb[47].mxu1 }
 0x158   : > { %v1220_v30 = vadd.f32 %v1821_v25, %v1709_v22  ;;  %v1824_v31 = vadd.f32 %v1823_v29, %v1822_v26 }
 0x15a   : > { %v1386_v32 = vadd.f32 %v2238_v41, %v1220_v30  ;;  %v1223_v33 = vadd.f32 %v1824_v31, %v1712_v28 }
 0x15b   : > { %v1713_v34 = vpop.f32.mrb[48].mxu0 }
 0x15c   : > { %1418 = vst [vmem:[%s2243_s20 + $0xb0] sm:$0xff] %v1386_v32  ;;  %v1387_v35 = vadd.f32 %v2238_v41, %v1223_v33  ;;  %v1825_v36 = vpop.f32.mrb[48].mxu1  ;;  %v1714_v37 = vpop.f32.mrb[49].mxu0 }
 0x15d   : > { %v1715_v38 = vadd.f32 %v1714_v37, %v1713_v34  ;;  %v1826_v39 = vpop.f32.mrb[49].mxu1  ;;  %v1716_v40 = vpop.f32.mrb[50].mxu0 }
 0x15e   : > { %1419 = vst [vmem:[%s2243_s20 + $0xb8] sm:$0xff] %v1387_v35  ;;  %v1827_v42 = vadd.f32 %v1826_v39, %v1825_v36  ;;  %v1828_v43 = vpop.f32.mrb[50].mxu1  ;;  %v1717_v44 = vpop.f32.mrb[51].mxu0 }
 0x15f   : > { %v1718_v45 = vadd.f32 %v1717_v44, %v1716_v40  ;;  %v1829_v46 = vpop.f32.mrb[51].mxu1 }
 0x160   : > { %v1228_v47 = vadd.f32 %v1827_v42, %v1715_v38  ;;  %v1830_v48 = vadd.f32 %v1829_v46, %v1828_v43 }
 0x162   : > { %v1388_v49 = vadd.f32 %v2238_v41, %v1228_v47  ;;  %v1231_v50 = vadd.f32 %v1830_v48, %v1718_v45 }
 0x163   : > { %v1719_v51 = vpop.f32.mrb[52].mxu0 }
 0x164   : > { %1420 = vst [vmem:[%s2243_s20 + $0xc0] sm:$0xff] %v1388_v49  ;;  %v1389_v52 = vadd.f32 %v2238_v41, %v1231_v50  ;;  %v1831_v53 = vpop.f32.mrb[52].mxu1  ;;  %v1720_v54 = vpop.f32.mrb[53].mxu0 }
 0x165   : > { %v1721_v55 = vadd.f32 %v1720_v54, %v1719_v51  ;;  %v1832_v56 = vpop.f32.mrb[53].mxu1  ;;  %v1722_v57 = vpop.f32.mrb[54].mxu0 }
 0x166   : > { %1421 = vst [vmem:[%s2243_s20 + $0xc8] sm:$0xff] %v1389_v52  ;;  %v1833_v58 = vadd.f32 %v1832_v56, %v1831_v53  ;;  %v1834_v59 = vpop.f32.mrb[54].mxu1  ;;  %v1723_v60 = vpop.f32.mrb[55].mxu0 }
 0x167   : > { %v1724_v61 = vadd.f32 %v1723_v60, %v1722_v57  ;;  %v1835_v62 = vpop.f32.mrb[55].mxu1 }
 0x168   : > { %v1236_v63 = vadd.f32 %v1833_v58, %v1721_v55  ;;  %v1836_v0 = vadd.f32 %v1835_v62, %v1834_v59 }
 0x16a   : > { %v1390_v1 = vadd.f32 %v2238_v41, %v1236_v63  ;;  %v1239_v2 = vadd.f32 %v1836_v0, %v1724_v61 }
 0x16b   : > { %v1725_v3 = vpop.f32.mrb[56].mxu0 }
 0x16c   : > { %1422 = vst [vmem:[%s2243_s20 + $0xd0] sm:$0xff] %v1390_v1  ;;  %v1391_v4 = vadd.f32 %v2238_v41, %v1239_v2  ;;  %v1837_v5 = vpop.f32.mrb[56].mxu1  ;;  %v1726_v6 = vpop.f32.mrb[57].mxu0 }
 0x16d   : > { %v1727_v7 = vadd.f32 %v1726_v6, %v1725_v3  ;;  %v1838_v8 = vpop.f32.mrb[57].mxu1  ;;  %v1728_v9 = vpop.f32.mrb[58].mxu0 }
 0x16e   : > { %1423 = vst [vmem:[%s2243_s20 + $0xd8] sm:$0xff] %v1391_v4  ;;  %v1839_v10 = vadd.f32 %v1838_v8, %v1837_v5  ;;  %v1840_v11 = vpop.f32.mrb[58].mxu1  ;;  %v1729_v12 = vpop.f32.mrb[59].mxu0 }
 0x16f   : > { %v1730_v13 = vadd.f32 %v1729_v12, %v1728_v9  ;;  %v1841_v14 = vpop.f32.mrb[59].mxu1 }
 0x170   : > { %v1244_v15 = vadd.f32 %v1839_v10, %v1727_v7  ;;  %v1842_v16 = vadd.f32 %v1841_v14, %v1840_v11 }
 0x172   : > { %v1392_v17 = vadd.f32 %v2238_v41, %v1244_v15  ;;  %v1247_v18 = vadd.f32 %v1842_v16, %v1730_v13 }
 0x173   : > { %v1731_v19 = vpop.f32.mrb[60].mxu0 }
 0x174   : > { %1424 = vst [vmem:[%s2243_s20 + $0xe0] sm:$0xff] %v1392_v17  ;;  %v1393_v20 = vadd.f32 %v2238_v41, %v1247_v18  ;;  %v1843_v21 = vpop.f32.mrb[60].mxu1  ;;  %v1732_v22 = vpop.f32.mrb[61].mxu0 }
 0x175   : > { %v1733_v23 = vadd.f32 %v1732_v22, %v1731_v19  ;;  %v1844_v24 = vpop.f32.mrb[61].mxu1  ;;  %v1734_v25 = vpop.f32.mrb[62].mxu0 }
 0x176   : > { %1425 = vst [vmem:[%s2243_s20 + $0xe8] sm:$0xff] %v1393_v20  ;;  %v1845_v26 = vadd.f32 %v1844_v24, %v1843_v21  ;;  %v1846_v27 = vpop.f32.mrb[62].mxu1  ;;  %v1735_v28 = vpop.f32.mrb[63].mxu0 }
 0x177   : > { %v1736_v29 = vadd.f32 %v1735_v28, %v1734_v25  ;;  %v1847_v30 = vpop.f32.mrb[63].mxu1 }
 0x178   : > { %v1252_v31 = vadd.f32 %v1845_v26, %v1733_v23  ;;  %v1848_v32 = vadd.f32 %v1847_v30, %v1846_v27 }
 0x17a   : > { %v1394_v33 = vadd.f32 %v2238_v41, %v1252_v31  ;;  %v1255_v34 = vadd.f32 %v1848_v32, %v1736_v29 }
 0x17c   : > { %1426 = vst [vmem:[%s2243_s20 + $0xf0] sm:$0xff] %v1394_v33  ;;  %v1395_v35 = vadd.f32 %v2238_v41, %v1255_v34 }
 0x17e   : > { %1427 = vst [vmem:[%s2243_s20 + $0xf8] sm:$0xff] %v1395_v35 }
 0x17f PF: > { %s13_s14 = sadd.s32 1, %s2023_s14   ;;  %s2322_s12 = smov %s2019_s13 }
 0x180   : > { %p10_p5 = scmp.ge.s32.totalorder %s13_s14, 4   ;;  %s2323_s13 = smov %s2325_s15 }
 0x182   :  { %12 = sbr.rel (!%p10_p5) target bundleno = 2 (0x2), region = 73 }

// kernel: net_forward.5
= control target key start
LH: loop header
LB: loop body
LE: loop exit
PB: predicated region body
PF: predicated region fallthrough
CT: control target
= control target key end

     0   :  { %s1054_s9 = smov 0   ;;  %s1138_s0 = inlined_call_operand.vmem [shape: bf16[512,128], index: 0, kind: input, shape index: {}]   ;;  %s1139_s1 = inlined_call_operand.vmem [shape: bf16[128,128], index: 1, kind: input, shape index: {}]   ;;  %s1140_s2 = inlined_call_operand.vmem [shape: bf16[512,128], index: 2, kind: output, shape index: {}]  }
   0x1 LB: > { %s717_s10 = sadd.s32 4294967295, %s1037_s9   ;;  %p721_p0 = scmp.ge.s32.totalorder %s1037_s9, 1  ;;  %s1037_s9 = sphi %s1054_s9, %s12_s9  }
   0x2   : > { %p113_p1 = scmp.lt.s32.totalorder %s1037_s9, 3 }
   0x4   : > { %p114_p2 = pnand %p721_p0, %p113_p1 }
   0x5   : > { %v1007_v0 = vld [vmem:[%s1139_s1] sm:$0xff] (!%p114_p2)   ;;  %s722_s13 = sshll.u32 (!%p114_p2), %s717_s10, 5  ;;  %v1008_v1 = vld [vmem:[%s1139_s1 + $0x8] sm:$0xff] (!%p114_p2)   ;;  %v1009_v2 = vld [vmem:[%s1139_s1 + $0x10] sm:$0xff] (!%p114_p2)  }
   0x6   : > { %117 = sbr.rel (%p114_p2) target bundleno = 280 (0x118), region = 28  ;;  %p136_p3 = scmp.lt.s32.totalorder (!%p114_p2), %s722_s13, 63  ;;  %935 = vmatprep.subr.bf16.mxu0 (!%p114_p2), %v1007_v0  ;;  %983 = vmatprep.subr.bf16.mxu1 (!%p114_p2), %v1007_v0  ;;  %v1010_v3 = vld [vmem:[%s1139_s1 + $0x18] sm:$0xff] (!%p114_p2)   ;;  %v1011_v6 = vld [vmem:[%s1139_s1 + $0x20] sm:$0xff] (!%p114_p2)   ;;  %v1012_v7 = vld [vmem:[%s1139_s1 + $0x28] sm:$0xff] (!%p114_p2)  }
   0x7   : > { %936 = vmatpush3.bf16.msra.mxu0 (!%p114_p2), %v1007_v0  ;;  %991 = vmatpush3.bf16.msra.mxu1 (!%p114_p2), %v1007_v0  ;;  %v1013_v8 = vld [vmem:[%s1139_s1 + $0x30] sm:$0xff] (!%p114_p2)   ;;  %v1014_v9 = vld [vmem:[%s1139_s1 + $0x38] sm:$0xff] (!%p114_p2)  }
   0x8   : > { %937 = vmatprep.subr.bf16.mxu0 (!%p114_p2), %v1008_v1  ;;  %984 = vmatprep.subr.bf16.mxu1 (!%p114_p2), %v1008_v1 }
   0xb   : > { %938 = vmatpush3.bf16.msra.mxu0 (!%p114_p2), %v1008_v1  ;;  %992 = vmatpush3.bf16.msra.mxu1 (!%p114_p2), %v1008_v1 }
   0xc   : > { %939 = vmatprep.subr.bf16.mxu0 (!%p114_p2), %v1009_v2  ;;  %985 = vmatprep.subr.bf16.mxu1 (!%p114_p2), %v1009_v2 }
   0xd   : > { %s1142_s13 = smov (!%p136_p3, %s722_s13), 63 }
   0xe   : > { %s723_s18 = sshll.u32 %s1142_s13, 2 }
   0xf   : > { %s1079_s21 = scalar_lea.vmem %s1138_s0, %s723_s18  ;;  %940 = vmatpush3.bf16.msra.mxu0 %v1009_v2  ;;  %993 = vmatpush3.bf16.msra.mxu1 %v1009_v2  ;;  %s1117_s6 = scalar_lea.vmem %s1140_s2, %s723_s18 }
  0x10   : > { %v1015_v4 = vld [vmem:[%s1079_s21] sm:$0xff]   ;;  %941 = vmatprep.subr.bf16.mxu0 %v1010_v3  ;;  %986 = vmatprep.subr.bf16.mxu1 %v1010_v3  ;;  %v1017_v10 = vld [vmem:[%s1079_s21 + $0x8] sm:$0xff]   ;;  %v1019_v12 = vld [vmem:[%s1079_s21 + $0x10] sm:$0xff]  }
  0x11   : > { %v1016_v5 = vld [vmem:[%s1079_s21 + $0x40] sm:$0xff]   ;;  %951 = vmatprep.mubr.bf16.mxu0 %v1015_v4  ;;  %v1018_v11 = vld [vmem:[%s1079_s21 + $0x48] sm:$0xff]   ;;  %v1020_v13 = vld [vmem:[%s1079_s21 + $0x50] sm:$0xff]  }
  0x12   : > { %967 = vmatprep.mubr.bf16.mxu1 %v1016_v5  ;;  %v1021_v14 = vld [vmem:[%s1079_s21 + $0x18] sm:$0xff]   ;;  %v1023_v16 = vld [vmem:[%s1079_s21 + $0x20] sm:$0xff]   ;;  %v1025_v18 = vld [vmem:[%s1079_s21 + $0x28] sm:$0xff]  }
  0x13   : > { %942 = vmatpush3.bf16.msra.mxu0 %v1010_v3  ;;  %994 = vmatpush3.bf16.msra.mxu1 %v1010_v3  ;;  %v1022_v15 = vld [vmem:[%s1079_s21 + $0x58] sm:$0xff]   ;;  %v1024_v17 = vld [vmem:[%s1079_s21 + $0x60] sm:$0xff]   ;;  %v1026_v19 = vld [vmem:[%s1079_s21 + $0x68] sm:$0xff]  }
  0x14   : > { %943 = vmatprep.subr.bf16.mxu0 %v1011_v6  ;;  %987 = vmatprep.subr.bf16.mxu1 %v1011_v6  ;;  %v1027_v20 = vld [vmem:[%s1079_s21 + $0x30] sm:$0xff]   ;;  %v1029_v22 = vld [vmem:[%s1079_s21 + $0x38] sm:$0xff]  }
  0x15   : > { %v1028_v21 = vld [vmem:[%s1079_s21 + $0x70] sm:$0xff]   ;;  %v1030_v23 = vld [vmem:[%s1079_s21 + $0x78] sm:$0xff]  }
  0x17   : > { %944 = vmatpush3.bf16.msra.mxu0 %v1011_v6  ;;  %995 = vmatpush3.bf16.msra.mxu1 %v1011_v6 }
  0x18   : > { %945 = vmatprep.subr.bf16.mxu0 %v1012_v7  ;;  %988 = vmatprep.subr.bf16.mxu1 %v1012_v7 }
  0x1b   : > { %946 = vmatpush3.bf16.msra.mxu0 %v1012_v7  ;;  %996 = vmatpush3.bf16.msra.mxu1 %v1012_v7 }
  0x1c   : > { %947 = vmatprep.subr.bf16.mxu0 %v1013_v8  ;;  %989 = vmatprep.subr.bf16.mxu1 %v1013_v8 }
  0x1f   : > { %948 = vmatpush3.bf16.msra.mxu0 %v1013_v8  ;;  %997 = vmatpush3.bf16.msra.mxu1 %v1013_v8 }
  0x20   : > { %949 = vmatprep.subr.bf16.mxu0 %v1014_v9  ;;  %990 = vmatprep.subr.bf16.mxu1 %v1014_v9 }
  0x23   : > { %950 = vmatpush3.bf16.msra.mxu0 %v1014_v9  ;;  %998 = vmatpush3.bf16.msra.mxu1 %v1014_v9 }
  0x26   : > { %952 = vmatmul.mubr.bf16.vlgmr.msra.gmra.mrb[0].mxu0 %v1017_v10  ;;  %968 = vmatmul.mubr.bf16.vlgmr.msra.gmra.mrb[0].mxu1 %v1018_v11 }
  0x27   : > { %955 = vmatprep.mubr.bf16.mxu0 %v1019_v12  ;;  %971 = vmatprep.mubr.bf16.mxu1 %v1020_v13 }
  0x2e   : > { %956 = vmatmul.mubr.bf16.gmra.mrb[4].mxu0 %v1021_v14  ;;  %972 = vmatmul.mubr.bf16.gmra.mrb[4].mxu1 %v1022_v15 }
  0x2f   : > { %959 = vmatprep.mubr.bf16.mxu0 %v1023_v16  ;;  %975 = vmatprep.mubr.bf16.mxu1 %v1024_v17 }
  0x36   : > { %960 = vmatmul.mubr.bf16.gmra.mrb[8].mxu0 %v1025_v18  ;;  %976 = vmatmul.mubr.bf16.gmra.mrb[8].mxu1 %v1026_v19 }
  0x37   : > { %963 = vmatprep.mubr.bf16.mxu0 %v1027_v20  ;;  %979 = vmatprep.mubr.bf16.mxu1 %v1028_v21 }
  0x3e   : > { %964 = vmatmul.mubr.bf16.gmra.mrb[12].mxu0 %v1029_v22  ;;  %980 = vmatmul.mubr.bf16.gmra.mrb[12].mxu1 %v1030_v23 }
  0xf9   : > { %v953_v24 = vpop.f32.mrb[0].mxu0  ;;  %v969_v25 = vpop.f32.mrb[0].mxu1 }
  0xfa   : > { %v374_v26 = vpop.f32.mrb[1].mxu0  ;;  %v438_v27 = vpop.f32.mrb[1].mxu1 }
  0xfb   : > { %v954_v28 = vpop.f32.mrb[2].mxu0  ;;  %v970_v29 = vpop.f32.mrb[2].mxu1 }
  0xfc   : > { %v824_v30 = vpack.c.bf16 %v954_v28, %v953_v24  ;;  %v864_v31 = vpack.c.bf16 %v970_v29, %v969_v25  ;;  %v377_v32 = vpop.f32.mrb[3].mxu0  ;;  %v441_v33 = vpop.f32.mrb[3].mxu1 }
  0xfd   : > { %v819_v34 = vpack.c.bf16 %v377_v32, %v374_v26  ;;  %v859_v35 = vpack.c.bf16 %v441_v33, %v438_v27 }
  0xfe   : > { %896 = vst [vmem:[%s1117_s6 + $0x8] sm:$0xff] %v824_v30   ;;  %904 = vst [vmem:[%s1117_s6 + $0x48] sm:$0xff] %v864_v31  }
  0xff   : > { %820 = vst [vmem:[%s1117_s6] sm:$0xff] %v819_v34   ;;  %903 = vst [vmem:[%s1117_s6 + $0x40] sm:$0xff] %v859_v35  }
 0x101   : > { %v957_v36 = vpop.f32.mrb[4].mxu0  ;;  %v973_v37 = vpop.f32.mrb[4].mxu1 }
 0x102   : > { %v390_v38 = vpop.f32.mrb[5].mxu0  ;;  %v454_v39 = vpop.f32.mrb[5].mxu1 }
 0x103   : > { %v958_v40 = vpop.f32.mrb[6].mxu0  ;;  %v974_v41 = vpop.f32.mrb[6].mxu1 }
 0x104   : > { %v834_v42 = vpack.c.bf16 %v958_v40, %v957_v36  ;;  %v874_v43 = vpack.c.bf16 %v974_v41, %v973_v37  ;;  %v393_v44 = vpop.f32.mrb[7].mxu0  ;;  %v457_v45 = vpop.f32.mrb[7].mxu1 }
 0x105   : > { %v829_v46 = vpack.c.bf16 %v393_v44, %v390_v38  ;;  %v869_v47 = vpack.c.bf16 %v457_v45, %v454_v39 }
 0x106   : > { %898 = vst [vmem:[%s1117_s6 + $0x18] sm:$0xff] %v834_v42   ;;  %906 = vst [vmem:[%s1117_s6 + $0x58] sm:$0xff] %v874_v43  }
 0x107   : > { %897 = vst [vmem:[%s1117_s6 + $0x10] sm:$0xff] %v829_v46   ;;  %905 = vst [vmem:[%s1117_s6 + $0x50] sm:$0xff] %v869_v47  }
 0x109   : > { %v961_v48 = vpop.f32.mrb[8].mxu0  ;;  %v977_v49 = vpop.f32.mrb[8].mxu1 }
 0x10a   : > { %v406_v50 = vpop.f32.mrb[9].mxu0  ;;  %v470_v51 = vpop.f32.mrb[9].mxu1 }
 0x10b   : > { %v962_v52 = vpop.f32.mrb[10].mxu0  ;;  %v978_v53 = vpop.f32.mrb[10].mxu1 }
 0x10c   : > { %v844_v54 = vpack.c.bf16 %v962_v52, %v961_v48  ;;  %v884_v55 = vpack.c.bf16 %v978_v53, %v977_v49  ;;  %v409_v56 = vpop.f32.mrb[11].mxu0  ;;  %v473_v57 = vpop.f32.mrb[11].mxu1 }
 0x10d   : > { %v839_v58 = vpack.c.bf16 %v409_v56, %v406_v50  ;;  %v879_v59 = vpack.c.bf16 %v473_v57, %v470_v51 }
 0x10e   : > { %900 = vst [vmem:[%s1117_s6 + $0x28] sm:$0xff] %v844_v54   ;;  %908 = vst [vmem:[%s1117_s6 + $0x68] sm:$0xff] %v884_v55  }
 0x10f   : > { %899 = vst [vmem:[%s1117_s6 + $0x20] sm:$0xff] %v839_v58   ;;  %907 = vst [vmem:[%s1117_s6 + $0x60] sm:$0xff] %v879_v59  }
 0x111   : > { %v965_v60 = vpop.f32.mrb[12].mxu0  ;;  %v981_v61 = vpop.f32.mrb[12].mxu1 }
 0x112   : > { %v422_v62 = vpop.f32.mrb[13].mxu0  ;;  %v486_v63 = vpop.f32.mrb[13].mxu1 }
 0x113   : > { %v966_v0 = vpop.f32.mrb[14].mxu0  ;;  %v982_v1 = vpop.f32.mrb[14].mxu1 }
 0x114   : > { %v854_v2 = vpack.c.bf16 %v966_v0, %v965_v60  ;;  %v894_v3 = vpack.c.bf16 %v982_v1, %v981_v61  ;;  %v425_v4 = vpop.f32.mrb[15].mxu0  ;;  %v489_v5 = vpop.f32.mrb[15].mxu1 }
 0x115   : > { %v849_v6 = vpack.c.bf16 %v425_v4, %v422_v62  ;;  %v889_v7 = vpack.c.bf16 %v489_v5, %v486_v63 }
 0x116   : > { %902 = vst [vmem:[%s1117_s6 + $0x38] sm:$0xff] %v854_v2   ;;  %910 = vst [vmem:[%s1117_s6 + $0x78] sm:$0xff] %v894_v3  }
 0x117   : > { %901 = vst [vmem:[%s1117_s6 + $0x30] sm:$0xff] %v849_v6   ;;  %909 = vst [vmem:[%s1117_s6 + $0x70] sm:$0xff] %v889_v7  }
 0x118 PF: > { %s12_s9 = sadd.s32 1, %s1037_s9  }
 0x119   : > { %p9_p4 = scmp.ge.s32.totalorder %s12_s9, 4  }
 0x11b   :  { %11 = sbr.rel (!%p9_p4) target bundleno = 1 (0x1), region = 58 }

// kernel: net_forward.7
= control target key start
LH: loop header
LB: loop body
LE: loop exit
PB: predicated region body
PF: predicated region fallthrough
CT: control target
= control target key end

     0   :  { %s199_s0 = inlined_call_operand.vmem [shape: f32[128,128], index: 0, kind: input, shape index: {}]   ;;  %s200_s1 = inlined_call_operand.vmem [shape: f32[128,128], index: 1, kind: input, shape index: {}]   ;;  %s201_s2 = inlined_call_operand.vmem [shape: f32[1,128], index: 2, kind: output, shape index: {}]  }
   0x1   :  { %v11_v0 = vld [vmem:[%s199_s0] sm:$0xff]  ;;  %v12_v1 = vld [vmem:[%s199_s0 + $0x8] sm:$0xff]  ;;  %v13_v2 = vld [vmem:[%s199_s0 + $0x10] sm:$0xff] }
   0x2   :  { %v14_v3 = vld [vmem:[%s199_s0 + $0x18] sm:$0xff]  ;;  %v27_v4 = vld [vmem:[%s200_s1] sm:$0xff]  ;;  %v28_v5 = vld [vmem:[%s200_s1 + $0x8] sm:$0xff] }
   0x3   :  { %v29_v6 = vld [vmem:[%s200_s1 + $0x10] sm:$0xff]  ;;  %v30_v7 = vld [vmem:[%s200_s1 + $0x18] sm:$0xff]  ;;  %v43_v8 = vmul.f32 %v27_v4, %v11_v0  ;;  %v44_v9 = vmul.f32 %v28_v5, %v12_v1  ;;  %v15_v10 = vld [vmem:[%s199_s0 + $0x20] sm:$0xff] }
   0x4   :  { %v31_v11 = vld [vmem:[%s200_s1 + $0x20] sm:$0xff]  ;;  %v45_v12 = vmul.f32 %v29_v6, %v13_v2  ;;  %v46_v13 = vmul.f32 %v30_v7, %v14_v3  ;;  %v16_v15 = vld [vmem:[%s199_s0 + $0x28] sm:$0xff]  ;;  %v17_v19 = vld [vmem:[%s199_s0 + $0x30] sm:$0xff] }
   0x5   :  { %v59_v14 = vadd.f32 %v44_v9, %v43_v8  ;;  %v32_v16 = vld [vmem:[%s200_s1 + $0x28] sm:$0xff]  ;;  %v47_v17 = vmul.f32 %v31_v11, %v15_v10  ;;  %v33_v20 = vld [vmem:[%s200_s1 + $0x30] sm:$0xff]  ;;  %v18_v23 = vld [vmem:[%s199_s0 + $0x38] sm:$0xff] }
   0x6   :  { %v48_v21 = vmul.f32 %v32_v16, %v16_v15  ;;  %v34_v24 = vld [vmem:[%s200_s1 + $0x38] sm:$0xff]  ;;  %v49_v25 = vmul.f32 %v33_v20, %v17_v19  ;;  %v19_v27 = vld [vmem:[%s199_s0 + $0x40] sm:$0xff]  ;;  %v20_v31 = vld [vmem:[%s199_s0 + $0x48] sm:$0xff] }
   0x7   :  { %v60_v18 = vadd.f32 %v59_v14, %v45_v12  ;;  %v35_v28 = vld [vmem:[%s200_s1 + $0x40] sm:$0xff]  ;;  %v50_v29 = vmul.f32 %v34_v24, %v18_v23  ;;  %v36_v32 = vld [vmem:[%s200_s1 + $0x48] sm:$0xff]  ;;  %v21_v35 = vld [vmem:[%s199_s0 + $0x50] sm:$0xff] }
   0x8   :  { %v51_v33 = vmul.f32 %v35_v28, %v19_v27  ;;  %v37_v36 = vld [vmem:[%s200_s1 + $0x50] sm:$0xff]  ;;  %v52_v37 = vmul.f32 %v36_v32, %v20_v31  ;;  %v22_v39 = vld [vmem:[%s199_s0 + $0x58] sm:$0xff]  ;;  %v23_v43 = vld [vmem:[%s199_s0 + $0x60] sm:$0xff] }
   0x9   :  { %v61_v22 = vadd.f32 %v60_v18, %v46_v13  ;;  %v38_v40 = vld [vmem:[%s200_s1 + $0x58] sm:$0xff]  ;;  %v53_v41 = vmul.f32 %v37_v36, %v21_v35  ;;  %v39_v44 = vld [vmem:[%s200_s1 + $0x60] sm:$0xff]  ;;  %v24_v47 = vld [vmem:[%s199_s0 + $0x68] sm:$0xff] }
   0xa   :  { %v54_v45 = vmul.f32 %v38_v40, %v22_v39  ;;  %v40_v48 = vld [vmem:[%s200_s1 + $0x68] sm:$0xff]  ;;  %v55_v49 = vmul.f32 %v39_v44, %v23_v43  ;;  %v25_v51 = vld [vmem:[%s199_s0 + $0x70] sm:$0xff]  ;;  %v26_v55 = vld [vmem:[%s199_s0 + $0x78] sm:$0xff] }
   0xb   :  { %v62_v26 = vadd.f32 %v61_v22, %v47_v17  ;;  %v41_v52 = vld [vmem:[%s200_s1 + $0x70] sm:$0xff]  ;;  %v56_v53 = vmul.f32 %v40_v48, %v24_v47  ;;  %v42_v56 = vld [vmem:[%s200_s1 + $0x78] sm:$0xff] }
   0xc   :  { %v57_v57 = vmul.f32 %v41_v52, %v25_v51  ;;  %v58_v59 = vmul.f32 %v42_v56, %v26_v55 }
   0xd   :  { %v63_v30 = vadd.f32 %v62_v26, %v48_v21 }
   0xf   :  { %v64_v34 = vadd.f32 %v63_v30, %v49_v25 }
  0x11   :  { %v65_v38 = vadd.f32 %v64_v34, %v50_v29 }
  0x13   :  { %v66_v42 = vadd.f32 %v65_v38, %v51_v33 }
  0x15   :  { %v67_v46 = vadd.f32 %v66_v42, %v52_v37 }
  0x17   :  { %v68_v50 = vadd.f32 %v67_v46, %v53_v41 }
  0x19   :  { %v69_v54 = vadd.f32 %v68_v50, %v54_v45 }
  0x1b   :  { %v70_v58 = vadd.f32 %v69_v54, %v55_v49 }
  0x1d   :  { %v71_v60 = vadd.f32 %v70_v58, %v56_v53 }
  0x1f   :  { %v72_v61 = vadd.f32 %v71_v60, %v57_v57 }
  0x21   :  { %v73_v62 = vadd.f32 %v72_v61, %v58_v59 }
  0x23   :  { %v74_v63 = vrot.slane %v73_v62, 4 }
  0x25   :  { %v75_v0 = vadd.f32 %v74_v63, %v73_v62 }
  0x27   :  { %v76_v1 = vrot.slane %v75_v0, 2 }
  0x29   :  { %v77_v2 = vadd.f32 %v76_v1, %v75_v0 }
  0x2b   :  { %v78_v3 = vrot.slane %v77_v2, 1 }
  0x2d   :  { %v79_v4 = vadd.f32 %v78_v3, %v77_v2 }
  0x2f   :  { %80 = vst [vmem:[%s201_s2] sm:$0x1] %v79_v4 }

// kernel: net_forward.4
= control target key start
LH: loop header
LB: loop body
LE: loop exit
PB: predicated region body
PF: predicated region fallthrough
CT: control target
= control target key end

     0   :  { %s2682_s15 = smov 0   ;;  %s2684_s16 = smov 0   ;;  %s3097_s0 = inlined_call_operand.vmem [shape: bf16[512,512], index: 0, kind: input, shape index: {}]   ;;  %s3098_s1 = inlined_call_operand.vmem [shape: bf16[512,8], index: 1, kind: input, shape index: {}]   ;;  %s3099_s2 = inlined_call_operand.vmem [shape: bf16[8,128], index: 2, kind: input, shape index: {}]   ;;  %s3100_s3 = inlined_call_operand.vmem [shape: f32[1,128], index: 3, kind: input, shape index: {}]   ;;  %s3101_s4 = inlined_call_operand.vmem [shape: bf16[512,128], index: 4, kind: output, shape index: {}]  }
   0x1   :  { %s2686_s17 = smov 0  }
   0x2 LB: > { %s26_s18 = sadd.s32 1, %s2650_s16  ;;  %p1906_p0 = scmp.ge.s32.totalorder %s2654_s17, 1  ;;  %s2654_s17 = sphi %s2686_s17, %s14_s17   ;;  %s2650_s16 = sphi %s2684_s16, %s3103_s16   ;;  %s2646_s15 = sphi %s2682_s15, %s3102_s15  }
   0x3   : > { %p28_p1 = scmp.ge.s32.totalorder %s26_s18, 2  ;;  %p194_p2 = scmp.lt.s32.totalorder %s2654_s17, 3 }
   0x5   : > { %s3105_s18 = smov (%p28_p1, %s26_s18), 0  ;;  %p195_p3 = pnand %p1906_p0, %p194_p2 }
   0x6   : > { %v2504_v0 = vld [vmem:[%s3098_s1 + $0x40] sm:$0xff] (!%p195_p3)   ;;  %s1907_s21 = sshll.u32 (!%p195_p3), %s2646_s15, 5  ;;  %v2506_v2 = vld [vmem:[%s3098_s1 + $0x48] sm:$0xff] (!%p195_p3)   ;;  %v2508_v4 = vld [vmem:[%s3098_s1 + $0x50] sm:$0xff] (!%p195_p3)   ;;  %vm1458_vm0 = vcmask (!%p195_p3), 1043456   ;;  %vm259_vm1 = vcmask (!%p195_p3), 64512  }
   0x7   : > { %198 = sbr.rel (%p195_p3) target bundleno = 644 (0x284), region = 36  ;;  %v2505_v1 = vld [vmem:[%s3098_s1] sm:$0xff] (!%p195_p3)   ;;  %2462 = vmatprep.subr.bf16.mxu1 (!%p195_p3), %v2504_v0  ;;  %2187 = vmatprep.subr.bf16.mxu0 (!%p195_p3), %v2504_v0  ;;  %v2507_v3 = vld [vmem:[%s3098_s1 + $0x8] sm:$0xff] (!%p195_p3)   ;;  %p232_p4 = scmp.lt.s32.totalorder (!%p195_p3), %s1907_s21, 63  ;;  %v2509_v5 = vld [vmem:[%s3098_s1 + $0x10] sm:$0xff] (!%p195_p3)  }
   0x8   : > { %2470 = vmatpush3.bf16.msra.mxu1 (!%p195_p3), %v2505_v1  ;;  %2188 = vmatpush3.bf16.msra.mxu0 (!%p195_p3), %v2505_v1  ;;  %v2510_v6 = vld [vmem:[%s3098_s1 + $0x58] sm:$0xff] (!%p195_p3)   ;;  %v2512_v8 = vld [vmem:[%s3098_s1 + $0x60] sm:$0xff] (!%p195_p3)   ;;  %v2514_v10 = vld [vmem:[%s3098_s1 + $0x68] sm:$0xff] (!%p195_p3)  }
   0x9   : > { %2463 = vmatprep.subr.bf16.mxu1 (!%p195_p3), %v2506_v2  ;;  %2189 = vmatprep.subr.bf16.mxu0 (!%p195_p3), %v2506_v2  ;;  %v2511_v7 = vld [vmem:[%s3098_s1 + $0x18] sm:$0xff] (!%p195_p3)   ;;  %v2513_v9 = vld [vmem:[%s3098_s1 + $0x20] sm:$0xff] (!%p195_p3)   ;;  %v2515_v12 = vld [vmem:[%s3098_s1 + $0x28] sm:$0xff] (!%p195_p3)  }
   0xa   : > { %v2516_v13 = vld [vmem:[%s3098_s1 + $0x70] sm:$0xff] (!%p195_p3)   ;;  %v2518_v15 = vld [vmem:[%s3098_s1 + $0x78] sm:$0xff] (!%p195_p3)   ;;  %v2523_v17 = vld [vmem:[%s3098_s1 + $0xc0] sm:$0xff] (!%p195_p3)  }
   0xb   : > { %v2517_v14 = vld [vmem:[%s3098_s1 + $0x30] sm:$0xff] (!%p195_p3)   ;;  %v2519_v16 = vld [vmem:[%s3098_s1 + $0x38] sm:$0xff] (!%p195_p3)   ;;  %v2524_v19 = vld [vmem:[%s3098_s1 + $0x80] sm:$0xff] (!%p195_p3)  }
   0xc   : > { %2471 = vmatpush3.bf16.msra.mxu1 (!%p195_p3), %v2507_v3  ;;  %2190 = vmatpush3.bf16.msra.mxu0 (!%p195_p3), %v2507_v3  ;;  %v2525_v21 = vld [vmem:[%s3098_s1 + $0xc8] sm:$0xff] (!%p195_p3)   ;;  %v2530_v24 = vld [vmem:[%s3098_s1 + $0xd0] sm:$0xff] (!%p195_p3)   ;;  %v2532_v28 = vld [vmem:[%s3098_s1 + $0xd8] sm:$0xff] (!%p195_p3)  }
   0xd   : > { %2464 = vmatprep.subr.bf16.mxu1 (!%p195_p3), %v2508_v4  ;;  %2191 = vmatprep.subr.bf16.mxu0 (!%p195_p3), %v2508_v4  ;;  %v2526_v22 = vld [vmem:[%s3098_s1 + $0x88] sm:$0xff] (!%p195_p3)   ;;  %v2531_v25 = vld [vmem:[%s3098_s1 + $0x90] sm:$0xff] (!%p195_p3)   ;;  %v2533_v31 = vld [vmem:[%s3098_s1 + $0x98] sm:$0xff] (!%p195_p3)  }
   0xe   : > { %s3107_s21 = smov (!%p232_p4, %s1907_s21), 63  ;;  %v2537_v33 = vld [vmem:[%s3098_s1 + $0xe0] sm:$0xff]   ;;  %v2539_v38 = vld [vmem:[%s3098_s1 + $0xe8] sm:$0xff]   ;;  %v2544_v41 = vld [vmem:[%s3098_s1 + $0xf0] sm:$0xff]  }
   0xf   : > { %s2059_s10 = sshll.u32 %s3107_s21, 4  ;;  %v2538_v36 = vld [vmem:[%s3098_s1 + $0xa0] sm:$0xff]   ;;  %v2540_v39 = vld [vmem:[%s3098_s1 + $0xa8] sm:$0xff]   ;;  %v2545_v44 = vld [vmem:[%s3098_s1 + $0xb0] sm:$0xff]   ;;  %s1911_s27 = sshll.u32 %s3107_s21, 2 }
  0x10   : > { %2472 = vmatpush3.bf16.msra.mxu1 %v2509_v5  ;;  %2192 = vmatpush3.bf16.msra.mxu0 %v2509_v5  ;;  %s2733_s15 = scalar_lea.vmem %s3097_s0, %s2059_s10  ;;  %v2546_v46 = vld [vmem:[%s3098_s1 + $0xf8] sm:$0xff]   ;;  %s3042_s30 = scalar_lea.vmem %s3101_s4, %s1911_s27 }
  0x11   : > { %2465 = vmatprep.subr.bf16.mxu1 %v2510_v6  ;;  %2193 = vmatprep.subr.bf16.mxu0 %v2510_v6  ;;  %v2522_v11 = vld [vmem:[%s2733_s15 + $0x184] ss:$16 sps:$4 sm:$0xff]   ;;  %v2520_v18 = vld [vmem:[%s2733_s15 + $0x180] ss:$16 sps:$4 sm:$0xff]   ;;  %v2553_v45 = vld [vmem:[%s2733_s15 + $0xc] ss:$16 sps:$4 sm:$0xff]  }
  0x12   : > { %1092 = vmatprep.mubr.bf16.mxu1 %v2522_v11  ;;  %v2527_v20 = vld [vmem:[%s2733_s15 + $0x1a4] ss:$16 sps:$4 sm:$0xff]   ;;  %v2529_v23 = vld [vmem:[%s2733_s15 + $0x1a0] ss:$16 sps:$4 sm:$0xff]   ;;  %v2547_v47 = vld [vmem:[%s3098_s1 + $0xb8] sm:$0xff]  }
  0x13   : > { %v2548_v26 = vld [vmem:[%s2733_s15] ss:$16 sps:$4 sm:$0xff]   ;;  %v2550_v27 = vld [vmem:[%s2733_s15 + $0x4] ss:$16 sps:$4 sm:$0xff]   ;;  %v2551_v48 = vld [vmem:[%s2733_s15 + $0x8] ss:$16 sps:$4 sm:$0xff]  }
  0x14   : > { %2473 = vmatpush3.bf16.msra.mxu1 %v2511_v7  ;;  %2194 = vmatpush3.bf16.msra.mxu0 %v2511_v7  ;;  %v2534_v29 = vld [vmem:[%s2733_s15 + $0x1c4] ss:$16 sps:$4 sm:$0xff]   ;;  %v2536_v32 = vld [vmem:[%s2733_s15 + $0x1c0] ss:$16 sps:$4 sm:$0xff]   ;;  %v2556_v51 = vld [vmem:[%s2733_s15 + $0x2c] ss:$16 sps:$4 sm:$0xff]  }
  0x15   : > { %2466 = vmatprep.subr.bf16.mxu1 %v2512_v8  ;;  %2195 = vmatprep.subr.bf16.mxu0 %v2512_v8  ;;  %v2554_v30 = vld [vmem:[%s2733_s15 + $0x24] ss:$16 sps:$4 sm:$0xff]   ;;  %v2558_v34 = vld [vmem:[%s2733_s15 + $0x20] ss:$16 sps:$4 sm:$0xff]   ;;  %v2559_v53 = vld [vmem:[%s2733_s15 + $0x28] ss:$16 sps:$4 sm:$0xff]  }
  0x16   : > { %996 = vmatprep.mubr.bf16.mxu0 %v2550_v27  ;;  %v2560_v35 = vld [vmem:[%s2733_s15 + $0x44] ss:$16 sps:$4 sm:$0xff]   ;;  %v2543_v40 = vld [vmem:[%s2733_s15 + $0x1e0] ss:$16 sps:$4 sm:$0xff]   ;;  %v2562_v55 = vld [vmem:[%s2733_s15 + $0x4c] ss:$16 sps:$4 sm:$0xff]  }
  0x17   : > { %v2541_v37 = vld [vmem:[%s2733_s15 + $0x1e4] ss:$16 sps:$4 sm:$0xff]   ;;  %v2564_v42 = vld [vmem:[%s2733_s15 + $0x40] ss:$16 sps:$4 sm:$0xff]   ;;  %v2565_v57 = vld [vmem:[%s2733_s15 + $0x48] ss:$16 sps:$4 sm:$0xff]  }
  0x18   : > { %2474 = vmatpush3.bf16.msra.mxu1 %v2513_v9  ;;  %2196 = vmatpush3.bf16.msra.mxu0 %v2513_v9  ;;  %v2566_v43 = vld [vmem:[%s2733_s15 + $0x64] ss:$16 sps:$4 sm:$0xff]   ;;  %v2570_v49 = vld [vmem:[%s2733_s15 + $0x60] ss:$16 sps:$4 sm:$0xff]   ;;  %v2568_v59 = vld [vmem:[%s2733_s15 + $0x6c] ss:$16 sps:$4 sm:$0xff]  }
  0x19   : > { %2467 = vmatprep.subr.bf16.mxu1 %v2514_v10  ;;  %2197 = vmatprep.subr.bf16.mxu0 %v2514_v10  ;;  %v2572_v50 = vld [vmem:[%s2733_s15 + $0x84] ss:$16 sps:$4 sm:$0xff]   ;;  %v2576_v52 = vld [vmem:[%s2733_s15 + $0x80] ss:$16 sps:$4 sm:$0xff]   ;;  %v2571_v61 = vld [vmem:[%s2733_s15 + $0x68] ss:$16 sps:$4 sm:$0xff]  }
  0x1a   : > { %v2578_v54 = vld [vmem:[%s2733_s15 + $0xa4] ss:$16 sps:$4 sm:$0xff]   ;;  %v2582_v56 = vld [vmem:[%s2733_s15 + $0xa0] ss:$16 sps:$4 sm:$0xff]   ;;  %v2574_v63 = vld [vmem:[%s2733_s15 + $0x8c] ss:$16 sps:$4 sm:$0xff]  }
  0x1b   : > { %v2584_v58 = vld [vmem:[%s2733_s15 + $0xc4] ss:$16 sps:$4 sm:$0xff]   ;;  %v2588_v60 = vld [vmem:[%s2733_s15 + $0xc0] ss:$16 sps:$4 sm:$0xff]   ;;  %v2577_v1 = vld [vmem:[%s2733_s15 + $0x88] ss:$16 sps:$4 sm:$0xff]  }
  0x1c   : > { %2475 = vmatpush3.bf16.msra.mxu1 %v2515_v12  ;;  %2198 = vmatpush3.bf16.msra.mxu0 %v2515_v12  ;;  %v2590_v62 = vld [vmem:[%s2733_s15 + $0xe4] ss:$16 sps:$4 sm:$0xff]   ;;  %v2594_v0 = vld [vmem:[%s2733_s15 + $0xe0] ss:$16 sps:$4 sm:$0xff]   ;;  %v2580_v3 = vld [vmem:[%s2733_s15 + $0xac] ss:$16 sps:$4 sm:$0xff]  }
  0x1d   : > { %2468 = vmatprep.subr.bf16.mxu1 %v2516_v13  ;;  %2199 = vmatprep.subr.bf16.mxu0 %v2516_v13  ;;  %v2596_v2 = vld [vmem:[%s2733_s15 + $0x104] ss:$16 sps:$4 sm:$0xff]   ;;  %v2600_v4 = vld [vmem:[%s2733_s15 + $0x100] ss:$16 sps:$4 sm:$0xff]   ;;  %v2583_v5 = vld [vmem:[%s2733_s15 + $0xa8] ss:$16 sps:$4 sm:$0xff]  }
  0x1e   : > { %v2602_v6 = vld [vmem:[%s2733_s15 + $0x124] ss:$16 sps:$4 sm:$0xff]   ;;  %v2586_v7 = vld [vmem:[%s2733_s15 + $0xcc] ss:$16 sps:$4 sm:$0xff]   ;;  %v2606_v8 = vld [vmem:[%s2733_s15 + $0x120] ss:$16 sps:$4 sm:$0xff]  }
  0x1f   : > { %v2589_v9 = vld [vmem:[%s2733_s15 + $0xc8] ss:$16 sps:$4 sm:$0xff]   ;;  %v2608_v10 = vld [vmem:[%s2733_s15 + $0x144] ss:$16 sps:$4 sm:$0xff]   ;;  %v2592_v11 = vld [vmem:[%s2733_s15 + $0xec] ss:$16 sps:$4 sm:$0xff]  }
  0x20   : > { %2476 = vmatpush3.bf16.msra.mxu1 %v2517_v14  ;;  %2200 = vmatpush3.bf16.msra.mxu0 %v2517_v14  ;;  %v2612_v12 = vld [vmem:[%s2733_s15 + $0x140] ss:$16 sps:$4 sm:$0xff]   ;;  %v2595_v13 = vld [vmem:[%s2733_s15 + $0xe8] ss:$16 sps:$4 sm:$0xff]   ;;  %v2614_v14 = vld [vmem:[%s2733_s15 + $0x164] ss:$16 sps:$4 sm:$0xff]  }
  0x21   : > { %2469 = vmatprep.subr.bf16.mxu1 %v2518_v15  ;;  %2201 = vmatprep.subr.bf16.mxu0 %v2518_v15  ;;  %v2598_v15 = vld [vmem:[%s2733_s15 + $0x10c] ss:$16 sps:$4 sm:$0xff]  }
  0x22   : > { %v2620_v27 = vld [vmem:[%s2733_s15 + $0x18c] ss:$16 sps:$4 sm:$0xff]  }
  0x24   : > { %2477 = vmatpush3.bf16.msra.mxu1 %v2519_v16  ;;  %2202 = vmatpush3.bf16.msra.mxu0 %v2519_v16  ;;  %v2618_v16 = vld [vmem:[%s2733_s15 + $0x160] ss:$16 sps:$4 sm:$0xff]  }
  0x25   : > { %2299 = vmatprep.subr.bf16.mxu1 %v2523_v17  ;;  %v2601_v17 = vld [vmem:[%s2733_s15 + $0x108] ss:$16 sps:$4 sm:$0xff]  }
  0x27   : > { %1093 = vmatmul.mubr.bf16.vlgmr.msra.gmra.mrb[0].mxu1 %v2520_v18  ;;  %997 = vmatmul.mubr.bf16.vlgmr.msra.gmra.mrb[0].mxu0 %v2548_v26  ;;  %v2604_v18 = vld [vmem:[%s2733_s15 + $0x12c] ss:$16 sps:$4 sm:$0xff]   ;;  %v2619_v26 = vld [vmem:[%s2733_s15 + $0x168] ss:$16 sps:$4 sm:$0xff]  }
  0x28   : > { %2300 = vmatpush3.bf16.msra.mxu1 %v2524_v19  ;;  %1100 = vmatprep.mubr.bf16.mxu1 %v2527_v20  ;;  %v2607_v19 = vld [vmem:[%s2733_s15 + $0x128] ss:$16 sps:$4 sm:$0xff]   ;;  %v2610_v20 = vld [vmem:[%s2733_s15 + $0x14c] ss:$16 sps:$4 sm:$0xff]  }
  0x29   : > { %2301 = vmatprep.subr.bf16.mxu1 %v2525_v21  ;;  %1004 = vmatprep.mubr.bf16.mxu0 %v2554_v30  ;;  %v1402_v21 = vld [vmem:[%s3099_s2] sm:$0xf]  ;;  %v2625_v30 = vld [vmem:[%s2733_s15 + $0x1a8] ss:$16 sps:$4 sm:$0xff]  }
  0x2a   : > { %2478 = vmatprep.subr.msk.bf16.mxu0 %vm1458_vm0, %v1402_v21 }
  0x2c   : > { %2302 = vmatpush3.bf16.msra.mxu1 %v2526_v22  ;;  %v1460_v22 = vsel %vm1458_vm0, %v1402_v21, 0 }
  0x2d   : > { %2303 = vmatprep.subr.bf16.mxu1 %v2530_v24  ;;  %2429 = vmatpush3.bf16.msra.mxu0 %v1460_v22  ;;  %v2616_v24 = vld [vmem:[%s2733_s15 + $0x16c] ss:$16 sps:$4 sm:$0xff]  }
  0x2f   : > { %1101 = vmatmul.mubr.bf16.gmra.mrb[4].mxu1 %v2529_v23  ;;  %1005 = vmatmul.mubr.bf16.gmra.mrb[4].mxu0 %v2558_v34  ;;  %v2613_v23 = vld [vmem:[%s2733_s15 + $0x148] ss:$16 sps:$4 sm:$0xff]  }
  0x30   : > { %2304 = vmatpush3.bf16.msra.mxu1 %v2531_v25  ;;  %1108 = vmatprep.mubr.bf16.mxu1 %v2534_v29  ;;  %v2656_v25 = vmov 0.0   ;;  %v2623_v29 = vld [vmem:[%s2733_s15 + $0x1ac] ss:$16 sps:$4 sm:$0xff]   ;;  %v2631_v34 = vld [vmem:[%s2733_s15 + $0x1e8] ss:$16 sps:$4 sm:$0xff]  }
  0x31   : > { %2305 = vmatprep.subr.bf16.mxu1 %v2532_v28  ;;  %1012 = vmatprep.mubr.bf16.mxu0 %v2560_v35  ;;  %260 = vst.msk [vmem:[#allocation2] sm:$0xff] %vm259_vm1, %v2656_v25  ;;  %261 = vst.msk [vmem:[#allocation2 + $0x8] sm:$0xff] %vm259_vm1, %v2656_v25  ;;  %v2622_v28 = vld [vmem:[%s2733_s15 + $0x188] ss:$16 sps:$4 sm:$0xff]  }
  0x32   : > { %262 = vst.msk [vmem:[#allocation2 + $0x10] sm:$0xff] %vm259_vm1, %v2656_v25  ;;  %263 = vst.msk [vmem:[#allocation2 + $0x18] sm:$0xff] %vm259_vm1, %v2656_v25 }
  0x33   : > { %264 = vst.msk [vmem:[#allocation2 + $0x20] sm:$0xff] %vm259_vm1, %v2656_v25  ;;  %265 = vst.msk [vmem:[#allocation2 + $0x28] sm:$0xff] %vm259_vm1, %v2656_v25 }
  0x34   : > { %2306 = vmatpush3.bf16.msra.mxu1 %v2533_v31  ;;  %266 = vst.msk [vmem:[#allocation2 + $0x30] sm:$0xff] %vm259_vm1, %v2656_v25  ;;  %267 = vst.msk [vmem:[#allocation2 + $0x38] sm:$0xff] %vm259_vm1, %v2656_v25  ;;  %v2626_v31 = vld [vmem:[%s2733_s15 + $0x1cc] ss:$16 sps:$4 sm:$0xff]  }
  0x35   : > { %2307 = vmatprep.subr.bf16.mxu1 %v2537_v33  ;;  %268 = vst.msk [vmem:[#allocation2 + $0x40] sm:$0xff] %vm259_vm1, %v2656_v25  ;;  %269 = vst.msk [vmem:[#allocation2 + $0x48] sm:$0xff] %vm259_vm1, %v2656_v25  ;;  %v2629_v33 = vld [vmem:[%s2733_s15 + $0x1ec] ss:$16 sps:$4 sm:$0xff]  }
  0x36   : > { %270 = vst.msk [vmem:[#allocation2 + $0x50] sm:$0xff] %vm259_vm1, %v2656_v25  ;;  %271 = vst.msk [vmem:[#allocation2 + $0x58] sm:$0xff] %vm259_vm1, %v2656_v25 }
  0x37   : > { %1109 = vmatmul.mubr.bf16.gmra.mrb[8].mxu1 %v2536_v32  ;;  %1013 = vmatmul.mubr.bf16.gmra.mrb[8].mxu0 %v2564_v42  ;;  %272 = vst.msk [vmem:[#allocation2 + $0x60] sm:$0xff] %vm259_vm1, %v2656_v25  ;;  %273 = vst.msk [vmem:[#allocation2 + $0x68] sm:$0xff] %vm259_vm1, %v2656_v25  ;;  %v2628_v32 = vld [vmem:[%s2733_s15 + $0x1c8] ss:$16 sps:$4 sm:$0xff]  }
  0x38   : > { %2308 = vmatpush3.bf16.msra.mxu1 %v2538_v36  ;;  %1116 = vmatprep.mubr.bf16.mxu1 %v2541_v37  ;;  %274 = vst.msk [vmem:[#allocation2 + $0x70] sm:$0xff] %vm259_vm1, %v2656_v25  ;;  %275 = vst.msk [vmem:[#allocation2 + $0x78] sm:$0xff] %vm259_vm1, %v2656_v25  ;;  %v292_v22 = vld [vmem:[#allocation2] sm:$0xff] }
  0x39   : > { %2309 = vmatprep.subr.bf16.mxu1 %v2539_v38  ;;  %1020 = vmatprep.mubr.bf16.mxu0 %v2566_v43  ;;  %276 = vst.msk [vmem:[#allocation2 + $0x80] sm:$0xff] %vm259_vm1, %v2656_v25  ;;  %277 = vst.msk [vmem:[#allocation2 + $0x88] sm:$0xff] %vm259_vm1, %v2656_v25 }
  0x3a   : > { %278 = vst.msk [vmem:[#allocation2 + $0x90] sm:$0xff] %vm259_vm1, %v2656_v25  ;;  %279 = vst.msk [vmem:[#allocation2 + $0x98] sm:$0xff] %vm259_vm1, %v2656_v25 }
  0x3b   : > { %280 = vst.msk [vmem:[#allocation2 + $0xa0] sm:$0xff] %vm259_vm1, %v2656_v25  ;;  %281 = vst.msk [vmem:[#allocation2 + $0xa8] sm:$0xff] %vm259_vm1, %v2656_v25 }
  0x3c   : > { %2310 = vmatpush3.bf16.msra.mxu1 %v2540_v39  ;;  %282 = vst.msk [vmem:[#allocation2 + $0xb0] sm:$0xff] %vm259_vm1, %v2656_v25  ;;  %283 = vst.msk [vmem:[#allocation2 + $0xb8] sm:$0xff] %vm259_vm1, %v2656_v25 }
  0x3d   : > { %2311 = vmatprep.subr.bf16.mxu1 %v2544_v41  ;;  %284 = vst.msk [vmem:[#allocation2 + $0xc0] sm:$0xff] %vm259_vm1, %v2656_v25  ;;  %285 = vst.msk [vmem:[#allocation2 + $0xc8] sm:$0xff] %vm259_vm1, %v2656_v25 }
  0x3e   : > { %286 = vst.msk [vmem:[#allocation2 + $0xd0] sm:$0xff] %vm259_vm1, %v2656_v25  ;;  %287 = vst.msk [vmem:[#allocation2 + $0xd8] sm:$0xff] %vm259_vm1, %v2656_v25 }
  0x3f   : > { %1117 = vmatmul.mubr.bf16.gmra.mrb[12].mxu1 %v2543_v40  ;;  %1021 = vmatmul.mubr.bf16.gmra.mrb[12].mxu0 %v2570_v49  ;;  %288 = vst.msk [vmem:[#allocation2 + $0xe0] sm:$0xff] %vm259_vm1, %v2656_v25  ;;  %289 = vst.msk [vmem:[#allocation2 + $0xe8] sm:$0xff] %vm259_vm1, %v2656_v25 }
  0x40   : > { %2312 = vmatpush3.bf16.msra.mxu1 %v2545_v44  ;;  %1157 = vmatprep.mubr.bf16.mxu1 %v2553_v45  ;;  %290 = vst.msk [vmem:[#allocation2 + $0xf0] sm:$0xff] %vm259_vm1, %v2656_v25  ;;  %291 = vst.msk [vmem:[#allocation2 + $0xf8] sm:$0xff] %vm259_vm1, %v2656_v25 }
  0x41   : > { %2313 = vmatprep.subr.bf16.mxu1 %v2546_v46  ;;  %1028 = vmatprep.mubr.bf16.mxu0 %v2572_v50 }
  0x44   : > { %2314 = vmatpush3.bf16.msra.mxu1 %v2547_v47 }
  0x47   : > { %1158 = vmatmul.mubr.bf16.vlgmr.msra.gmra.mrb[16].mxu1 %v2551_v48  ;;  %1029 = vmatmul.mubr.bf16.gmra.mrb[16].mxu0 %v2576_v52 }
  0x48   : > { %1165 = vmatprep.mubr.bf16.mxu1 %v2556_v51  ;;  %1036 = vmatprep.mubr.bf16.mxu0 %v2578_v54 }
  0x4f   : > { %1166 = vmatmul.mubr.bf16.gmra.mrb[20].mxu1 %v2559_v53  ;;  %1037 = vmatmul.mubr.bf16.gmra.mrb[20].mxu0 %v2582_v56 }
  0x50   : > { %1173 = vmatprep.mubr.bf16.mxu1 %v2562_v55  ;;  %1044 = vmatprep.mubr.bf16.mxu0 %v2584_v58 }
  0x57   : > { %1174 = vmatmul.mubr.bf16.gmra.mrb[24].mxu1 %v2565_v57  ;;  %1045 = vmatmul.mubr.bf16.gmra.mrb[24].mxu0 %v2588_v60 }
  0x58   : > { %1181 = vmatprep.mubr.bf16.mxu1 %v2568_v59  ;;  %1052 = vmatprep.mubr.bf16.mxu0 %v2590_v62 }
  0x5f   : > { %1182 = vmatmul.mubr.bf16.gmra.mrb[28].mxu1 %v2571_v61  ;;  %1053 = vmatmul.mubr.bf16.gmra.mrb[28].mxu0 %v2594_v0 }
  0x60   : > { %1189 = vmatprep.mubr.bf16.mxu1 %v2574_v63  ;;  %1060 = vmatprep.mubr.bf16.mxu0 %v2596_v2 }
  0x67   : > { %1190 = vmatmul.mubr.bf16.gmra.mrb[32].mxu1 %v2577_v1  ;;  %1061 = vmatmul.mubr.bf16.gmra.mrb[32].mxu0 %v2600_v4 }
  0x68   : > { %1197 = vmatprep.mubr.bf16.mxu1 %v2580_v3  ;;  %1068 = vmatprep.mubr.bf16.mxu0 %v2602_v6 }
  0x6f   : > { %1198 = vmatmul.mubr.bf16.gmra.mrb[36].mxu1 %v2583_v5  ;;  %1069 = vmatmul.mubr.bf16.gmra.mrb[36].mxu0 %v2606_v8 }
  0x70   : > { %1205 = vmatprep.mubr.bf16.mxu1 %v2586_v7  ;;  %1076 = vmatprep.mubr.bf16.mxu0 %v2608_v10 }
  0x77   : > { %1206 = vmatmul.mubr.bf16.gmra.mrb[40].mxu1 %v2589_v9  ;;  %1077 = vmatmul.mubr.bf16.gmra.mrb[40].mxu0 %v2612_v12 }
  0x78   : > { %1213 = vmatprep.mubr.bf16.mxu1 %v2592_v11  ;;  %1084 = vmatprep.mubr.bf16.mxu0 %v2614_v14 }
  0x7f   : > { %1214 = vmatmul.mubr.bf16.gmra.mrb[44].mxu1 %v2595_v13  ;;  %1085 = vmatmul.mubr.bf16.gmra.mrb[44].mxu0 %v2618_v16 }
  0x80   : > { %1221 = vmatprep.mubr.bf16.mxu1 %v2598_v15 }
  0x87   : > { %1222 = vmatmul.mubr.bf16.gmra.mrb[48].mxu1 %v2601_v17 }
  0x88   : > { %1229 = vmatprep.mubr.bf16.mxu1 %v2604_v18 }
  0x8f   : > { %1230 = vmatmul.mubr.bf16.gmra.mrb[52].mxu1 %v2607_v19 }
  0x90   : > { %1237 = vmatprep.mubr.bf16.mxu1 %v2610_v20 }
  0x97   : > { %1238 = vmatmul.mubr.bf16.gmra.mrb[56].mxu1 %v2613_v23 }
  0x98   : > { %1245 = vmatprep.mubr.bf16.mxu1 %v2616_v24 }
  0x9f   : > { %1246 = vmatmul.mubr.bf16.gmra.mrb[60].mxu1 %v2619_v26 }
  0xa0   : > { %1253 = vmatprep.mubr.bf16.mxu1 %v2620_v27  ;;  %v293_v27 = vld [vmem:[#allocation2 + $0x8] sm:$0xff] }
  0xa7   : > { %1254 = vmatmul.mubr.bf16.gmra.mrb[64].mxu1 %v2622_v28 }
  0xa8   : > { %1261 = vmatprep.mubr.bf16.mxu1 %v2623_v29 }
  0xaf   : > { %1262 = vmatmul.mubr.bf16.gmra.mrb[68].mxu1 %v2625_v30 }
  0xb0   : > { %1269 = vmatprep.mubr.bf16.mxu1 %v2626_v31 }
  0xb7   : > { %1270 = vmatmul.mubr.bf16.gmra.mrb[72].mxu1 %v2628_v32 }
  0xb8   : > { %1277 = vmatprep.mubr.bf16.mxu1 %v2629_v33 }
  0xbf   : > { %1278 = vmatmul.mubr.bf16.gmra.mrb[76].mxu1 %v2631_v34 }
  0xfa   : > { %v2275_v35 = vpop.f32.mrb[0].mxu1  ;;  %v2203_v41 = vpop.f32.mrb[0].mxu0 }
  0xfb   : > { %v2276_v36 = vpop.f32.mrb[1].mxu1  ;;  %v2204_v43 = vpop.f32.mrb[1].mxu0 }
  0xfc   : > { %v2903_v37 = vadd.f32 %v2276_v36, %v2275_v35  ;;  %v2278_v38 = vpop.f32.mrb[2].mxu1  ;;  %v2205_v45 = vadd.f32 %v2204_v43, %v2203_v41  ;;  %v2206_v46 = vpop.f32.mrb[2].mxu0 }
  0xfd   : > { %v2279_v39 = vpop.f32.mrb[3].mxu1  ;;  %v2207_v49 = vpop.f32.mrb[3].mxu0 }
  0xfe   : > { %v2905_v40 = vadd.f32 %v2279_v39, %v2278_v38  ;;  %v2208_v51 = vadd.f32 %v2207_v49, %v2206_v46 }
 0x102   : > { %v2281_v42 = vpop.f32.mrb[4].mxu1  ;;  %v2209_v53 = vpop.f32.mrb[4].mxu0 }
 0x103   : > { %v2282_v44 = vpop.f32.mrb[5].mxu1  ;;  %v2210_v55 = vpop.f32.mrb[5].mxu0 }
 0x104   : > { %v2907_v47 = vadd.f32 %v2282_v44, %v2281_v42  ;;  %v2284_v48 = vpop.f32.mrb[6].mxu1  ;;  %v2211_v57 = vadd.f32 %v2210_v55, %v2209_v53  ;;  %v2212_v58 = vpop.f32.mrb[6].mxu0  ;;  %v294_v42 = vld [vmem:[#allocation2 + $0x10] sm:$0xff] }
 0x105   : > { %v2285_v50 = vpop.f32.mrb[7].mxu1  ;;  %v2213_v61 = vpop.f32.mrb[7].mxu0 }
 0x106   : > { %v2909_v52 = vadd.f32 %v2285_v50, %v2284_v48  ;;  %v2214_v63 = vadd.f32 %v2213_v61, %v2212_v58  ;;  %v295_v48 = vld [vmem:[#allocation2 + $0x18] sm:$0xff] }
 0x10a   : > { %v2287_v54 = vpop.f32.mrb[8].mxu1  ;;  %v2215_v1 = vpop.f32.mrb[8].mxu0 }
 0x10b   : > { %v2288_v56 = vpop.f32.mrb[9].mxu1  ;;  %v2216_v3 = vpop.f32.mrb[9].mxu0 }
 0x10c   : > { %v2911_v59 = vadd.f32 %v2288_v56, %v2287_v54  ;;  %v2290_v60 = vpop.f32.mrb[10].mxu1  ;;  %v2915_v5 = vadd.f32 %v2216_v3, %v2215_v1  ;;  %v2218_v6 = vpop.f32.mrb[10].mxu0 }
 0x10d   : > { %v2291_v62 = vpop.f32.mrb[11].mxu1  ;;  %v2219_v9 = vpop.f32.mrb[11].mxu0 }
 0x10e   : > { %v2913_v0 = vadd.f32 %v2291_v62, %v2290_v60  ;;  %v2220_v11 = vadd.f32 %v2219_v9, %v2218_v6 }
 0x112   : > { %v2293_v2 = vpop.f32.mrb[12].mxu1  ;;  %v2221_v13 = vpop.f32.mrb[12].mxu0 }
 0x113   : > { %v2294_v4 = vpop.f32.mrb[13].mxu1  ;;  %v2222_v15 = vpop.f32.mrb[13].mxu0 }
 0x114   : > { %v2917_v7 = vadd.f32 %v2294_v4, %v2293_v2  ;;  %v2296_v8 = vpop.f32.mrb[14].mxu1  ;;  %v2921_v17 = vadd.f32 %v2222_v15, %v2221_v13  ;;  %v2224_v18 = vpop.f32.mrb[14].mxu0  ;;  %v296_v4 = vld [vmem:[#allocation2 + $0x20] sm:$0xff] }
 0x115   : > { %v2297_v10 = vpop.f32.mrb[15].mxu1  ;;  %v2225_v21 = vpop.f32.mrb[15].mxu0 }
 0x116   : > { %v2919_v12 = vadd.f32 %v2297_v10, %v2296_v8  ;;  %v2923_v24 = vadd.f32 %v2225_v21, %v2224_v18  ;;  %v297_v10 = vld [vmem:[#allocation2 + $0x28] sm:$0xff] }
 0x11a   : > { %v2315_v14 = vpop.f32.mrb[16].mxu1  ;;  %v2227_v30 = vpop.f32.mrb[16].mxu0 }
 0x11b   : > { %v2316_v16 = vpop.f32.mrb[17].mxu1  ;;  %v2228_v33 = vpop.f32.mrb[17].mxu0 }
 0x11c   : > { %v2317_v19 = vadd.f32 %v2316_v16, %v2315_v14  ;;  %v2318_v20 = vpop.f32.mrb[18].mxu1  ;;  %v2926_v35 = vadd.f32 %v2228_v33, %v2227_v30  ;;  %v2230_v36 = vpop.f32.mrb[18].mxu0  ;;  %v299_v33 = vld [vmem:[#allocation2 + $0x38] sm:$0xff] }
 0x11d   : > { %v2319_v23 = vpop.f32.mrb[19].mxu1  ;;  %v2231_v41 = vpop.f32.mrb[19].mxu0 }
 0x11e   : > { %v1160_v25 = vadd.f32 %v2317_v19, %v2205_v45  ;;  %v2320_v26 = vadd.f32 %v2319_v23, %v2318_v20  ;;  %v2929_v44 = vadd.f32 %v2231_v41, %v2230_v36 }
 0x120   : > { %v1286_v28 = vadd.f32 %v1160_v25, %v292_v22  ;;  %v1163_v29 = vadd.f32 %v2320_v26, %v2208_v51 }
 0x122   : > { %1319 = vst.msk [vmem:[#allocation2] sm:$0xff] %vm259_vm1, %v1286_v28  ;;  %v1287_v31 = vadd.f32 %v1163_v29, %v293_v27  ;;  %v2321_v32 = vpop.f32.mrb[20].mxu1  ;;  %v2233_v51 = vpop.f32.mrb[20].mxu0  ;;  %v298_v29 = vld [vmem:[#allocation2 + $0x30] sm:$0xff] }
 0x123   : > { %v2322_v34 = vpop.f32.mrb[21].mxu1  ;;  %v2234_v55 = vpop.f32.mrb[21].mxu0 }
 0x124   : > { %1320 = vst.msk [vmem:[#allocation2 + $0x8] sm:$0xff] %vm259_vm1, %v1287_v31  ;;  %v2323_v38 = vadd.f32 %v2322_v34, %v2321_v32  ;;  %v2324_v39 = vpop.f32.mrb[22].mxu1  ;;  %v2932_v61 = vadd.f32 %v2234_v55, %v2233_v51  ;;  %v2236_v62 = vpop.f32.mrb[22].mxu0 }
 0x125   : > { %v2325_v43 = vpop.f32.mrb[23].mxu1  ;;  %v2237_v3 = vpop.f32.mrb[23].mxu0 }
 0x126   : > { %v1168_v45 = vadd.f32 %v2323_v38, %v2211_v57  ;;  %v2326_v46 = vadd.f32 %v2325_v43, %v2324_v39  ;;  %v2935_v6 = vadd.f32 %v2237_v3, %v2236_v62 }
 0x128   : > { %v1288_v49 = vadd.f32 %v1168_v45, %v294_v42  ;;  %v1171_v50 = vadd.f32 %v2326_v46, %v2214_v63 }
 0x129   : > { %v1354_v58 = vld [vmem:[#allocation2] sm:$0xff] }
 0x12a   : > { %1321 = vst.msk [vmem:[#allocation2 + $0x10] sm:$0xff] %vm259_vm1, %v1288_v49  ;;  %v1289_v53 = vadd.f32 %v1171_v50, %v295_v48  ;;  %v2327_v54 = vpop.f32.mrb[24].mxu1  ;;  %v2239_v15 = vpop.f32.mrb[24].mxu0 }
 0x12b   : > { %v2328_v56 = vpop.f32.mrb[25].mxu1  ;;  %v1355_v60 = vld [vmem:[#allocation2 + $0x8] sm:$0xff]  ;;  %v2240_v19 = vpop.f32.mrb[25].mxu0 }
 0x12c   : > { %1322 = vst.msk [vmem:[#allocation2 + $0x18] sm:$0xff] %vm259_vm1, %v1289_v53  ;;  %v2329_v1 = vadd.f32 %v2328_v56, %v2327_v54  ;;  %v2330_v57 = vpop.f32.mrb[26].mxu1  ;;  %v1386_v2 = vpack.c.bf16 %v1355_v60, %v1354_v58  ;;  %v2940_v23 = vadd.f32 %v2240_v19, %v2239_v15  ;;  %v2242_v25 = vpop.f32.mrb[26].mxu0  ;;  %v300_v54 = vld [vmem:[#allocation2 + $0x40] sm:$0xff]  ;;  %v301_v60 = vld [vmem:[#allocation2 + $0x48] sm:$0xff] }
 0x12d   : > { %v2331_v63 = vpop.f32.mrb[27].mxu1  ;;  %v2243_v28 = vpop.f32.mrb[27].mxu0 }
 0x12e   : > { %v1176_v8 = vadd.f32 %v2329_v1, %v2915_v5  ;;  %v2332_v9 = vadd.f32 %v2331_v63, %v2330_v57  ;;  %2430 = vmatprep.mubr.msk.bf16.mxu0 %vm259_vm1, %v1386_v2  ;;  %v2943_v30 = vadd.f32 %v2243_v28, %v2242_v25 }
 0x130   : > { %v1290_v13 = vadd.f32 %v1176_v8, %v296_v4  ;;  %v1179_v14 = vadd.f32 %v2332_v9, %v2220_v11 }
 0x131   : > { %v1356_v21 = vld [vmem:[#allocation2 + $0x10] sm:$0xff] }
 0x132   : > { %1323 = vst.msk [vmem:[#allocation2 + $0x20] sm:$0xff] %vm259_vm1, %v1290_v13  ;;  %v1291_v16 = vadd.f32 %v1179_v14, %v297_v10  ;;  %v2333_v18 = vpop.f32.mrb[28].mxu1  ;;  %v2245_v38 = vpop.f32.mrb[28].mxu0 }
 0x133   : > { %v2334_v20 = vpop.f32.mrb[29].mxu1  ;;  %v1357_v22 = vld [vmem:[#allocation2 + $0x18] sm:$0xff]  ;;  %v2246_v42 = vpop.f32.mrb[29].mxu0 }
 0x134   : > { %1324 = vst.msk [vmem:[#allocation2 + $0x28] sm:$0xff] %vm259_vm1, %v1291_v16  ;;  %v2335_v5 = vadd.f32 %v2334_v20, %v2333_v18  ;;  %v2336_v26 = vpop.f32.mrb[30].mxu1  ;;  %v1387_v27 = vpack.c.bf16 %v1357_v22, %v1356_v21  ;;  %v2949_v48 = vadd.f32 %v2246_v42, %v2245_v38  ;;  %v2248_v49 = vpop.f32.mrb[30].mxu0  ;;  %v302_v18 = vld [vmem:[#allocation2 + $0x50] sm:$0xff]  ;;  %v303_v22 = vld [vmem:[#allocation2 + $0x58] sm:$0xff] }
 0x135   : > { %v2337_v11 = vpop.f32.mrb[31].mxu1  ;;  %v2249_v53 = vpop.f32.mrb[31].mxu0 }
 0x136   : > { %v1184_v31 = vadd.f32 %v2335_v5, %v2921_v17  ;;  %v2338_v32 = vadd.f32 %v2337_v11, %v2336_v26  ;;  %2431 = vmatmul.mubr.msk.bf16.vlgmr.msra.gmra.mrb[48].mxu0 %vm259_vm1, %v1387_v27  ;;  %v2952_v55 = vadd.f32 %v2249_v53, %v2248_v49 }
 0x138   : > { %v1292_v34 = vadd.f32 %v1184_v31, %v298_v29  ;;  %v1187_v36 = vadd.f32 %v2338_v32, %v2923_v24 }
 0x139   : > { %v1358_v45 = vld [vmem:[#allocation2 + $0x20] sm:$0xff] }
 0x13a   : > { %1325 = vst.msk [vmem:[#allocation2 + $0x30] sm:$0xff] %vm259_vm1, %v1292_v34  ;;  %v1293_v39 = vadd.f32 %v1187_v36, %v299_v33  ;;  %v2339_v41 = vpop.f32.mrb[32].mxu1  ;;  %v2251_v57 = vpop.f32.mrb[32].mxu0 }
 0x13b   : > { %v2340_v43 = vpop.f32.mrb[33].mxu1  ;;  %v1359_v46 = vld [vmem:[#allocation2 + $0x28] sm:$0xff]  ;;  %v2252_v4 = vpop.f32.mrb[33].mxu0 }
 0x13c   : > { %1326 = vst.msk [vmem:[#allocation2 + $0x38] sm:$0xff] %vm259_vm1, %v1293_v39  ;;  %v2341_v17 = vadd.f32 %v2340_v43, %v2339_v41  ;;  %v2342_v50 = vpop.f32.mrb[34].mxu1  ;;  %v1388_v51 = vpack.c.bf16 %v1359_v46, %v1358_v45  ;;  %v2958_v10 = vadd.f32 %v2252_v4, %v2251_v57  ;;  %v2254_v13 = vpop.f32.mrb[34].mxu0  ;;  %v304_v41 = vld [vmem:[#allocation2 + $0x60] sm:$0xff]  ;;  %v305_v46 = vld [vmem:[#allocation2 + $0x68] sm:$0xff] }
 0x13d   : > { %v2343_v24 = vpop.f32.mrb[35].mxu1  ;;  %v2255_v16 = vpop.f32.mrb[35].mxu0 }
 0x13e   : > { %v1192_v56 = vadd.f32 %v2341_v17, %v2926_v35  ;;  %v2344_v58 = vadd.f32 %v2343_v24, %v2342_v50  ;;  %2434 = vmatprep.mubr.msk.bf16.mxu0 %vm259_vm1, %v1388_v51  ;;  %v2961_v19 = vadd.f32 %v2255_v16, %v2254_v13 }
 0x140   : > { %v1294_v62 = vadd.f32 %v1192_v56, %v300_v54  ;;  %v1195_v1 = vadd.f32 %v2344_v58, %v2929_v44 }
 0x141   : > { %v1360_v8 = vld [vmem:[#allocation2 + $0x30] sm:$0xff] }
 0x142   : > { %1327 = vst.msk [vmem:[#allocation2 + $0x40] sm:$0xff] %vm259_vm1, %v1294_v62  ;;  %v1295_v2 = vadd.f32 %v1195_v1, %v301_v60  ;;  %v2345_v3 = vpop.f32.mrb[36].mxu1  ;;  %v2257_v26 = vpop.f32.mrb[36].mxu0 }
 0x143   : > { %v2346_v63 = vpop.f32.mrb[37].mxu1  ;;  %v1361_v9 = vld [vmem:[#allocation2 + $0x38] sm:$0xff]  ;;  %v2258_v29 = vpop.f32.mrb[37].mxu0 }
 0x144   : > { %1328 = vst.msk [vmem:[#allocation2 + $0x48] sm:$0xff] %vm259_vm1, %v1295_v2  ;;  %v2347_v35 = vadd.f32 %v2346_v63, %v2345_v3  ;;  %v2348_v14 = vpop.f32.mrb[38].mxu1  ;;  %v1389_v15 = vpack.c.bf16 %v1361_v9, %v1360_v8  ;;  %v2967_v33 = vadd.f32 %v2258_v29, %v2257_v26  ;;  %v2260_v34 = vpop.f32.mrb[38].mxu0  ;;  %v306_v3 = vld [vmem:[#allocation2 + $0x70] sm:$0xff]  ;;  %v307_v9 = vld [vmem:[#allocation2 + $0x78] sm:$0xff] }
 0x145   : > { %v2349_v44 = vpop.f32.mrb[39].mxu1  ;;  %v2261_v39 = vpop.f32.mrb[39].mxu0 }
 0x146   : > { %v1200_v20 = vadd.f32 %v2347_v35, %v2932_v61  ;;  %v2350_v21 = vadd.f32 %v2349_v44, %v2348_v14  ;;  %2435 = vmatmul.mubr.msk.bf16.gmra.mrb[52].mxu0 %vm259_vm1, %v1389_v15  ;;  %v2970_v42 = vadd.f32 %v2261_v39, %v2260_v34 }
 0x148   : > { %v1296_v25 = vadd.f32 %v1200_v20, %v302_v18  ;;  %v1203_v5 = vadd.f32 %v2350_v21, %v2935_v6 }
 0x149   : > { %v1362_v31 = vld [vmem:[#allocation2 + $0x40] sm:$0xff] }
 0x14a   : > { %1329 = vst.msk [vmem:[#allocation2 + $0x50] sm:$0xff] %vm259_vm1, %v1296_v25  ;;  %v1297_v27 = vadd.f32 %v1203_v5, %v303_v22  ;;  %v2351_v28 = vpop.f32.mrb[40].mxu1  ;;  %v2263_v50 = vpop.f32.mrb[40].mxu0 }
 0x14b   : > { %v2352_v11 = vpop.f32.mrb[41].mxu1  ;;  %v1363_v32 = vld [vmem:[#allocation2 + $0x48] sm:$0xff]  ;;  %v2264_v54 = vpop.f32.mrb[41].mxu0 }
 0x14c   : > { %1330 = vst.msk [vmem:[#allocation2 + $0x58] sm:$0xff] %vm259_vm1, %v1297_v27  ;;  %v2353_v61 = vadd.f32 %v2352_v11, %v2351_v28  ;;  %v2354_v36 = vpop.f32.mrb[42].mxu1  ;;  %v1390_v38 = vpack.c.bf16 %v1363_v32, %v1362_v31  ;;  %v2976_v60 = vadd.f32 %v2264_v54, %v2263_v50  ;;  %v2266_v62 = vpop.f32.mrb[42].mxu0  ;;  %v308_v28 = vld [vmem:[#allocation2 + $0x80] sm:$0xff]  ;;  %v309_v32 = vld [vmem:[#allocation2 + $0x88] sm:$0xff] }
 0x14d   : > { %v2355_v6 = vpop.f32.mrb[43].mxu1  ;;  %v2267_v2 = vpop.f32.mrb[43].mxu0 }
 0x14e   : > { %v1208_v43 = vadd.f32 %v2353_v61, %v2940_v23  ;;  %v2356_v45 = vadd.f32 %v2355_v6, %v2354_v36  ;;  %2438 = vmatprep.mubr.msk.bf16.mxu0 %vm259_vm1, %v1390_v38  ;;  %v2979_v4 = vadd.f32 %v2267_v2, %v2266_v62 }
 0x150   : > { %v1298_v49 = vadd.f32 %v1208_v43, %v304_v41  ;;  %v1211_v17 = vadd.f32 %v2356_v45, %v2943_v30 }
 0x151   : > { %v1364_v56 = vld [vmem:[#allocation2 + $0x50] sm:$0xff] }
 0x152   : > { %1331 = vst.msk [vmem:[#allocation2 + $0x60] sm:$0xff] %vm259_vm1, %v1298_v49  ;;  %v1299_v51 = vadd.f32 %v1211_v17, %v305_v46  ;;  %v2357_v53 = vpop.f32.mrb[44].mxu1  ;;  %v2269_v14 = vpop.f32.mrb[44].mxu0 }
 0x153   : > { %v2358_v24 = vpop.f32.mrb[45].mxu1  ;;  %v1365_v58 = vld [vmem:[#allocation2 + $0x58] sm:$0xff]  ;;  %v2270_v18 = vpop.f32.mrb[45].mxu0 }
 0x154   : > { %1332 = vst.msk [vmem:[#allocation2 + $0x68] sm:$0xff] %vm259_vm1, %v1299_v51  ;;  %v2359_v23 = vadd.f32 %v2358_v24, %v2357_v53  ;;  %v2360_v1 = vpop.f32.mrb[46].mxu1  ;;  %v1391_v57 = vpack.c.bf16 %v1365_v58, %v1364_v56  ;;  %v2985_v22 = vadd.f32 %v2270_v18, %v2269_v14  ;;  %v2272_v25 = vpop.f32.mrb[46].mxu0 }
 0x155   : > { %v2361_v30 = vpop.f32.mrb[47].mxu1  ;;  %v2273_v27 = vpop.f32.mrb[47].mxu0 }
 0x156   : > { %v1216_v63 = vadd.f32 %v2359_v23, %v2949_v48  ;;  %v2362_v8 = vadd.f32 %v2361_v30, %v2360_v1  ;;  %2439 = vmatmul.mubr.msk.bf16.gmra.mrb[56].mxu0 %vm259_vm1, %v1391_v57  ;;  %v2274_v29 = vadd.f32 %v2273_v27, %v2272_v25 }
 0x158   : > { %v1300_v13 = vadd.f32 %v1216_v63, %v306_v3  ;;  %v1219_v35 = vadd.f32 %v2362_v8, %v2952_v55 }
 0x159   : > { %v1366_v20 = vld [vmem:[#allocation2 + $0x60] sm:$0xff] }
 0x15a   : > { %1333 = vst.msk [vmem:[#allocation2 + $0x70] sm:$0xff] %vm259_vm1, %v1300_v13  ;;  %v1301_v15 = vadd.f32 %v1219_v35, %v307_v9  ;;  %v2363_v16 = vpop.f32.mrb[48].mxu1 }
 0x15b   : > { %v2364_v44 = vpop.f32.mrb[49].mxu1  ;;  %v1367_v21 = vld [vmem:[#allocation2 + $0x68] sm:$0xff] }
 0x15c   : > { %1334 = vst.msk [vmem:[#allocation2 + $0x78] sm:$0xff] %vm259_vm1, %v1301_v15  ;;  %v2365_v48 = vadd.f32 %v2364_v44, %v2363_v16  ;;  %v2366_v5 = vpop.f32.mrb[50].mxu1  ;;  %v1392_v26 = vpack.c.bf16 %v1367_v21, %v1366_v20 }
 0x15d   : > { %v2367_v55 = vpop.f32.mrb[51].mxu1 }
 0x15e   : > { %v1224_v11 = vadd.f32 %v2365_v48, %v2958_v10  ;;  %v2368_v31 = vadd.f32 %v2367_v55, %v2366_v5  ;;  %2442 = vmatprep.mubr.msk.bf16.mxu0 %vm259_vm1, %v1392_v26  ;;  %v310_v10 = vld [vmem:[#allocation2 + $0x90] sm:$0xff] }
 0x160   : > { %v1302_v34 = vadd.f32 %v1224_v11, %v308_v28  ;;  %v1227_v61 = vadd.f32 %v2368_v31, %v2961_v19  ;;  %v311_v19 = vld [vmem:[#allocation2 + $0x98] sm:$0xff] }
 0x161   : > { %v1368_v41 = vld [vmem:[#allocation2 + $0x70] sm:$0xff] }
 0x162   : > { %1335 = vst.msk [vmem:[#allocation2 + $0x80] sm:$0xff] %vm259_vm1, %v1302_v34  ;;  %v1303_v36 = vadd.f32 %v1227_v61, %v309_v32  ;;  %v2369_v38 = vpop.f32.mrb[52].mxu1  ;;  %v316_v61 = vld [vmem:[#allocation2 + $0xc0] sm:$0xff] }
 0x163   : > { %v2370_v39 = vpop.f32.mrb[53].mxu1  ;;  %v1369_v6 = vld [vmem:[#allocation2 + $0x78] sm:$0xff] }
 0x164   : > { %1336 = vst.msk [vmem:[#allocation2 + $0x88] sm:$0xff] %vm259_vm1, %v1303_v36  ;;  %v2371_v43 = vadd.f32 %v2370_v39, %v2369_v38  ;;  %v2372_v45 = vpop.f32.mrb[54].mxu1  ;;  %v1393_v46 = vpack.c.bf16 %v1369_v6, %v1368_v41 }
 0x165   : > { %v2373_v49 = vpop.f32.mrb[55].mxu1 }
 0x166   : > { %v1232_v17 = vadd.f32 %v2371_v43, %v2967_v33  ;;  %v2374_v50 = vadd.f32 %v2373_v49, %v2372_v45  ;;  %2443 = vmatmul.mubr.msk.bf16.gmra.mrb[60].mxu0 %vm259_vm1, %v1393_v46  ;;  %v312_v33 = vld [vmem:[#allocation2 + $0xa0] sm:$0xff] }
 0x168   : > { %v1304_v51 = vadd.f32 %v1232_v17, %v310_v10  ;;  %v1235_v53 = vadd.f32 %v2374_v50, %v2970_v42  ;;  %v313_v42 = vld [vmem:[#allocation2 + $0xa8] sm:$0xff] }
 0x169   : > { %v1370_v58 = vld [vmem:[#allocation2 + $0x80] sm:$0xff] }
 0x16a   : > { %1337 = vst.msk [vmem:[#allocation2 + $0x90] sm:$0xff] %vm259_vm1, %v1304_v51  ;;  %v1305_v54 = vadd.f32 %v1235_v53, %v311_v19  ;;  %v2375_v24 = vpop.f32.mrb[56].mxu1 }
 0x16b   : > { %v2376_v56 = vpop.f32.mrb[57].mxu1  ;;  %v1371_v62 = vld [vmem:[#allocation2 + $0x88] sm:$0xff] }
 0x16c   : > { %1338 = vst.msk [vmem:[#allocation2 + $0x98] sm:$0xff] %vm259_vm1, %v1305_v54  ;;  %v2377_v23 = vadd.f32 %v2376_v56, %v2375_v24  ;;  %v2378_v1 = vpop.f32.mrb[58].mxu1  ;;  %v1394_v57 = vpack.c.bf16 %v1371_v62, %v1370_v58 }
 0x16d   : > { %v2379_v2 = vpop.f32.mrb[59].mxu1 }
 0x16e   : > { %v1240_v3 = vadd.f32 %v2377_v23, %v2976_v60  ;;  %v2380_v30 = vadd.f32 %v2379_v2, %v2378_v1  ;;  %2446 = vmatprep.mubr.msk.bf16.mxu0 %vm259_vm1, %v1394_v57  ;;  %v314_v60 = vld [vmem:[#allocation2 + $0xb0] sm:$0xff] }
 0x170   : > { %v1306_v63 = vadd.f32 %v1240_v3, %v312_v33  ;;  %v1243_v8 = vadd.f32 %v2380_v30, %v2979_v4  ;;  %v315_v4 = vld [vmem:[#allocation2 + $0xb8] sm:$0xff] }
 0x171   : > { %v1372_v14 = vld [vmem:[#allocation2 + $0x90] sm:$0xff] }
 0x172   : > { %1339 = vst.msk [vmem:[#allocation2 + $0xa0] sm:$0xff] %vm259_vm1, %v1306_v63  ;;  %v1307_v9 = vadd.f32 %v1243_v8, %v313_v42  ;;  %v2381_v13 = vpop.f32.mrb[60].mxu1 }
 0x173   : > { %v2382_v35 = vpop.f32.mrb[61].mxu1  ;;  %v1373_v15 = vld [vmem:[#allocation2 + $0x98] sm:$0xff] }
 0x174   : > { %1340 = vst.msk [vmem:[#allocation2 + $0xa8] sm:$0xff] %vm259_vm1, %v1307_v9  ;;  %v2383_v16 = vadd.f32 %v2382_v35, %v2381_v13  ;;  %v2384_v18 = vpop.f32.mrb[62].mxu1  ;;  %v1395_v44 = vpack.c.bf16 %v1373_v15, %v1372_v14 }
 0x175   : > { %v2385_v20 = vpop.f32.mrb[63].mxu1 }
 0x176   : > { %v1248_v21 = vadd.f32 %v2383_v16, %v2985_v22  ;;  %v2386_v25 = vadd.f32 %v2385_v20, %v2384_v18  ;;  %2447 = vmatmul.mubr.msk.bf16.gmra.mrb[64].mxu0 %vm259_vm1, %v1395_v44 }
 0x178   : > { %v1308_v48 = vadd.f32 %v1248_v21, %v314_v60  ;;  %v1251_v5 = vadd.f32 %v2386_v25, %v2274_v29  ;;  %v317_v29 = vld [vmem:[#allocation2 + $0xc8] sm:$0xff] }
 0x179   : > { %v1374_v55 = vld [vmem:[#allocation2 + $0xa0] sm:$0xff] }
 0x17a   : > { %1341 = vst.msk [vmem:[#allocation2 + $0xb0] sm:$0xff] %vm259_vm1, %v1308_v48  ;;  %v1309_v26 = vadd.f32 %v1251_v5, %v315_v4  ;;  %v2387_v27 = vpop.f32.mrb[64].mxu1 }
 0x17b   : > { %v2388_v28 = vpop.f32.mrb[65].mxu1  ;;  %v1375_v11 = vld [vmem:[#allocation2 + $0xa8] sm:$0xff] }
 0x17c   : > { %1342 = vst.msk [vmem:[#allocation2 + $0xb8] sm:$0xff] %vm259_vm1, %v1309_v26  ;;  %v2389_v31 = vadd.f32 %v2388_v28, %v2387_v27  ;;  %v2390_v32 = vpop.f32.mrb[66].mxu1  ;;  %v1396_v34 = vpack.c.bf16 %v1375_v11, %v1374_v55 }
 0x17d   : > { %v2391_v22 = vpop.f32.mrb[67].mxu1 }
 0x17e   : > { %v1256_v36 = vadd.f32 %v2389_v31, %v2903_v37  ;;  %v2392_v38 = vadd.f32 %v2391_v22, %v2390_v32  ;;  %2450 = vmatprep.mubr.msk.bf16.mxu0 %vm259_vm1, %v1396_v34  ;;  %v318_v37 = vld [vmem:[#allocation2 + $0xd0] sm:$0xff] }
 0x180   : > { %v1310_v39 = vadd.f32 %v1256_v36, %v316_v61  ;;  %v1259_v41 = vadd.f32 %v2392_v38, %v2905_v40  ;;  %v319_v40 = vld [vmem:[#allocation2 + $0xd8] sm:$0xff] }
 0x181   : > { %v1376_v46 = vld [vmem:[#allocation2 + $0xb0] sm:$0xff] }
 0x182   : > { %1343 = vst.msk [vmem:[#allocation2 + $0xc0] sm:$0xff] %vm259_vm1, %v1310_v39  ;;  %v1311_v6 = vadd.f32 %v1259_v41, %v317_v29  ;;  %v2393_v43 = vpop.f32.mrb[68].mxu1 }
 0x183   : > { %v2394_v45 = vpop.f32.mrb[69].mxu1  ;;  %v1377_v10 = vld [vmem:[#allocation2 + $0xb8] sm:$0xff] }
 0x184   : > { %1344 = vst.msk [vmem:[#allocation2 + $0xc8] sm:$0xff] %vm259_vm1, %v1311_v6  ;;  %v2395_v49 = vadd.f32 %v2394_v45, %v2393_v43  ;;  %v2396_v17 = vpop.f32.mrb[70].mxu1  ;;  %v1397_v50 = vpack.c.bf16 %v1377_v10, %v1376_v46 }
 0x185   : > { %v2397_v19 = vpop.f32.mrb[71].mxu1 }
 0x186   : > { %v1264_v51 = vadd.f32 %v2395_v49, %v2907_v47  ;;  %v2398_v53 = vadd.f32 %v2397_v19, %v2396_v17  ;;  %2451 = vmatmul.mubr.msk.bf16.gmra.mrb[68].mxu0 %vm259_vm1, %v1397_v50  ;;  %v320_v47 = vld [vmem:[#allocation2 + $0xe0] sm:$0xff] }
 0x188   : > { %v1312_v54 = vadd.f32 %v1264_v51, %v318_v37  ;;  %v1267_v24 = vadd.f32 %v2398_v53, %v2909_v52  ;;  %v321_v52 = vld [vmem:[#allocation2 + $0xe8] sm:$0xff] }
 0x189   : > { %v1378_v23 = vld [vmem:[#allocation2 + $0xc0] sm:$0xff] }
 0x18a   : > { %1345 = vst.msk [vmem:[#allocation2 + $0xd0] sm:$0xff] %vm259_vm1, %v1312_v54  ;;  %v1313_v56 = vadd.f32 %v1267_v24, %v319_v40  ;;  %v2399_v58 = vpop.f32.mrb[72].mxu1 }
 0x18b   : > { %v2400_v62 = vpop.f32.mrb[73].mxu1  ;;  %v1379_v1 = vld [vmem:[#allocation2 + $0xc8] sm:$0xff] }
 0x18c   : > { %1346 = vst.msk [vmem:[#allocation2 + $0xd8] sm:$0xff] %vm259_vm1, %v1313_v56  ;;  %v2401_v57 = vadd.f32 %v2400_v62, %v2399_v58  ;;  %v2402_v33 = vpop.f32.mrb[74].mxu1  ;;  %v1398_v2 = vpack.c.bf16 %v1379_v1, %v1378_v23 }
 0x18d   : > { %v2403_v3 = vpop.f32.mrb[75].mxu1 }
 0x18e   : > { %v1272_v30 = vadd.f32 %v2401_v57, %v2911_v59  ;;  %v2404_v42 = vadd.f32 %v2403_v3, %v2402_v33  ;;  %2454 = vmatprep.mubr.msk.bf16.mxu0 %vm259_vm1, %v1398_v2  ;;  %v322_v59 = vld [vmem:[#allocation2 + $0xf0] sm:$0xff] }
 0x190   : > { %v1314_v63 = vadd.f32 %v1272_v30, %v320_v47  ;;  %v1275_v8 = vadd.f32 %v2404_v42, %v2913_v0  ;;  %v323_v0 = vld [vmem:[#allocation2 + $0xf8] sm:$0xff] }
 0x191   : > { %v1380_v14 = vld [vmem:[#allocation2 + $0xd0] sm:$0xff] }
 0x192   : > { %1347 = vst.msk [vmem:[#allocation2 + $0xe0] sm:$0xff] %vm259_vm1, %v1314_v63  ;;  %v1315_v9 = vadd.f32 %v1275_v8, %v321_v52  ;;  %v2405_v13 = vpop.f32.mrb[76].mxu1 }
 0x193   : > { %v2406_v35 = vpop.f32.mrb[77].mxu1  ;;  %v1381_v15 = vld [vmem:[#allocation2 + $0xd8] sm:$0xff] }
 0x194   : > { %1348 = vst.msk [vmem:[#allocation2 + $0xe8] sm:$0xff] %vm259_vm1, %v1315_v9  ;;  %v2407_v16 = vadd.f32 %v2406_v35, %v2405_v13  ;;  %v2408_v18 = vpop.f32.mrb[78].mxu1  ;;  %v1399_v44 = vpack.c.bf16 %v1381_v15, %v1380_v14 }
 0x195   : > { %v2409_v60 = vpop.f32.mrb[79].mxu1 }
 0x196   : > { %v1280_v20 = vadd.f32 %v2407_v16, %v2917_v7  ;;  %v2410_v21 = vadd.f32 %v2409_v60, %v2408_v18  ;;  %2455 = vmatmul.mubr.msk.bf16.gmra.mrb[72].mxu0 %vm259_vm1, %v1399_v44 }
 0x198   : > { %v1316_v25 = vadd.f32 %v1280_v20, %v322_v59  ;;  %v1283_v4 = vadd.f32 %v2410_v21, %v2919_v12  ;;  %v3032_v12 = vld [vmem:[%s3100_s3] ss:$0 sm:$0xff] }
 0x199   : > { %v1382_v5 = vld [vmem:[#allocation2 + $0xe0] sm:$0xff] }
 0x19a   : > { %1349 = vst.msk [vmem:[#allocation2 + $0xf0] sm:$0xff] %vm259_vm1, %v1316_v25  ;;  %v1317_v48 = vadd.f32 %v1283_v4, %v323_v0 }
 0x19b   : > { %v1383_v26 = vld [vmem:[#allocation2 + $0xe8] sm:$0xff] }
 0x19c   : > { %1350 = vst.msk [vmem:[#allocation2 + $0xf8] sm:$0xff] %vm259_vm1, %v1317_v48  ;;  %v1400_v27 = vpack.c.bf16 %v1383_v26, %v1382_v5 }
 0x19e   : > { %2458 = vmatprep.mubr.msk.bf16.mxu0 %vm259_vm1, %v1400_v27 }
 0x1a1   : > { %v1384_v28 = vld [vmem:[#allocation2 + $0xf0] sm:$0xff] }
 0x1a3   : > { %v1385_v7 = vld [vmem:[#allocation2 + $0xf8] sm:$0xff] }
 0x1a4   : > { %v1401_v55 = vpack.c.bf16 %v1385_v7, %v1384_v28 }
 0x1a6   : > { %2459 = vmatmul.mubr.msk.bf16.gmra.mrb[76].mxu0 %vm259_vm1, %v1401_v55 }
 0x209   : > { %v2432_v11 = vpop.f32.mrb[48].mxu0 }
 0x20a   : > { %v1505_v31 = vadd.f32 %v2432_v11, %v3032_v12  ;;  %v1496_v32 = vpop.f32.mrb[49].mxu0 }
 0x20b   : > { %v1497_v34 = vadd.f32 %v3032_v12, %v1496_v32  ;;  %v2433_v61 = vpop.f32.mrb[50].mxu0 }
 0x20c   : > { %v1508_v22 = vadd.f32 %v2433_v61, %v3032_v12  ;;  %v1499_v36 = vpop.f32.mrb[51].mxu0  ;;  %v1625_v29 = vmax.f32 %v1505_v31, 0.0 }
 0x20d   : > { %v1500_v38 = vadd.f32 %v3032_v12, %v1499_v36  ;;  %v1623_v41 = vmax.f32 %v1497_v34, 0.0 }
 0x20e   : > { %v1626_v39 = vmax.f32 %v1508_v22, 0.0 }
 0x20f   : > { %v1624_v6 = vmax.f32 %v1500_v38, 0.0 }
 0x210   : > { %v2100_v43 = vpack.c.bf16 %v1626_v39, %v1625_v29 }
 0x211   : > { %v2095_v45 = vpack.c.bf16 %v1624_v6, %v1623_v41 }
 0x212   : > { %2172 = vst [vmem:[%s3042_s30 + $0x8] sm:$0xff] %v2100_v43  }
 0x213   : > { %2096 = vst [vmem:[%s3042_s30] sm:$0xff] %v2095_v45  }
 0x219   : > { %v2436_v46 = vpop.f32.mrb[52].mxu0 }
 0x21a   : > { %v1521_v10 = vadd.f32 %v2436_v46, %v3032_v12  ;;  %v1512_v49 = vpop.f32.mrb[53].mxu0 }
 0x21b   : > { %v1513_v17 = vadd.f32 %v3032_v12, %v1512_v49  ;;  %v2437_v50 = vpop.f32.mrb[54].mxu0 }
 0x21c   : > { %v1524_v37 = vadd.f32 %v2437_v50, %v3032_v12  ;;  %v1515_v19 = vpop.f32.mrb[55].mxu0  ;;  %v1629_v53 = vmax.f32 %v1521_v10, 0.0 }
 0x21d   : > { %v1516_v51 = vadd.f32 %v3032_v12, %v1515_v19  ;;  %v1627_v54 = vmax.f32 %v1513_v17, 0.0 }
 0x21e   : > { %v1630_v40 = vmax.f32 %v1524_v37, 0.0 }
 0x21f   : > { %v1628_v24 = vmax.f32 %v1516_v51, 0.0 }
 0x220   : > { %v2110_v56 = vpack.c.bf16 %v1630_v40, %v1629_v53 }
 0x221   : > { %v2105_v58 = vpack.c.bf16 %v1628_v24, %v1627_v54 }
 0x222   : > { %2174 = vst [vmem:[%s3042_s30 + $0x18] sm:$0xff] %v2110_v56  }
 0x223   : > { %2173 = vst [vmem:[%s3042_s30 + $0x10] sm:$0xff] %v2105_v58  }
 0x229   : > { %v2440_v62 = vpop.f32.mrb[56].mxu0 }
 0x22a   : > { %v1537_v23 = vadd.f32 %v2440_v62, %v3032_v12  ;;  %v1528_v1 = vpop.f32.mrb[57].mxu0 }
 0x22b   : > { %v1529_v57 = vadd.f32 %v3032_v12, %v1528_v1  ;;  %v2441_v33 = vpop.f32.mrb[58].mxu0 }
 0x22c   : > { %v1540_v2 = vadd.f32 %v2441_v33, %v3032_v12  ;;  %v1531_v47 = vpop.f32.mrb[59].mxu0  ;;  %v1633_v30 = vmax.f32 %v1537_v23, 0.0 }
 0x22d   : > { %v1532_v3 = vadd.f32 %v3032_v12, %v1531_v47  ;;  %v1631_v52 = vmax.f32 %v1529_v57, 0.0 }
 0x22e   : > { %v1634_v42 = vmax.f32 %v1540_v2, 0.0 }
 0x22f   : > { %v1632_v63 = vmax.f32 %v1532_v3, 0.0 }
 0x230   : > { %v2120_v8 = vpack.c.bf16 %v1634_v42, %v1633_v30 }
 0x231   : > { %v2115_v9 = vpack.c.bf16 %v1632_v63, %v1631_v52 }
 0x232   : > { %2176 = vst [vmem:[%s3042_s30 + $0x28] sm:$0xff] %v2120_v8  }
 0x233   : > { %2175 = vst [vmem:[%s3042_s30 + $0x20] sm:$0xff] %v2115_v9  }
 0x239   : > { %v2444_v13 = vpop.f32.mrb[60].mxu0 }
 0x23a   : > { %v1553_v35 = vadd.f32 %v2444_v13, %v3032_v12  ;;  %v1544_v14 = vpop.f32.mrb[61].mxu0 }
 0x23b   : > { %v1545_v15 = vadd.f32 %v3032_v12, %v1544_v14  ;;  %v2445_v16 = vpop.f32.mrb[62].mxu0 }
 0x23c   : > { %v1556_v18 = vadd.f32 %v2445_v16, %v3032_v12  ;;  %v1547_v44 = vpop.f32.mrb[63].mxu0  ;;  %v1637_v60 = vmax.f32 %v1553_v35, 0.0 }
 0x23d   : > { %v1548_v59 = vadd.f32 %v3032_v12, %v1547_v44  ;;  %v1635_v21 = vmax.f32 %v1545_v15, 0.0 }
 0x23e   : > { %v1638_v20 = vmax.f32 %v1556_v18, 0.0 }
 0x23f   : > { %v1636_v0 = vmax.f32 %v1548_v59, 0.0 }
 0x240   : > { %v2130_v25 = vpack.c.bf16 %v1638_v20, %v1637_v60 }
 0x241   : > { %v2125_v4 = vpack.c.bf16 %v1636_v0, %v1635_v21 }
 0x242   : > { %2178 = vst [vmem:[%s3042_s30 + $0x38] sm:$0xff] %v2130_v25  }
 0x243   : > { %2177 = vst [vmem:[%s3042_s30 + $0x30] sm:$0xff] %v2125_v4  }
 0x249   : > { %v2448_v48 = vpop.f32.mrb[64].mxu0 }
 0x24a   : > { %v1569_v5 = vadd.f32 %v2448_v48, %v3032_v12  ;;  %v1560_v26 = vpop.f32.mrb[65].mxu0 }
 0x24b   : > { %v1561_v27 = vadd.f32 %v3032_v12, %v1560_v26  ;;  %v2449_v28 = vpop.f32.mrb[66].mxu0 }
 0x24c   : > { %v1572_v7 = vadd.f32 %v2449_v28, %v3032_v12  ;;  %v1563_v55 = vpop.f32.mrb[67].mxu0  ;;  %v1641_v31 = vmax.f32 %v1569_v5, 0.0 }
 0x24d   : > { %v1564_v11 = vadd.f32 %v3032_v12, %v1563_v55  ;;  %v1639_v34 = vmax.f32 %v1561_v27, 0.0 }
 0x24e   : > { %v1642_v32 = vmax.f32 %v1572_v7, 0.0 }
 0x24f   : > { %v1640_v61 = vmax.f32 %v1564_v11, 0.0 }
 0x250   : > { %v2140_v22 = vpack.c.bf16 %v1642_v32, %v1641_v31 }
 0x251   : > { %v2135_v36 = vpack.c.bf16 %v1640_v61, %v1639_v34 }
 0x252   : > { %2180 = vst [vmem:[%s3042_s30 + $0x48] sm:$0xff] %v2140_v22  }
 0x253   : > { %2179 = vst [vmem:[%s3042_s30 + $0x40] sm:$0xff] %v2135_v36  }
 0x259   : > { %v2452_v38 = vpop.f32.mrb[68].mxu0 }
 0x25a   : > { %v1585_v29 = vadd.f32 %v2452_v38, %v3032_v12  ;;  %v1576_v39 = vpop.f32.mrb[69].mxu0 }
 0x25b   : > { %v1577_v41 = vadd.f32 %v3032_v12, %v1576_v39  ;;  %v2453_v6 = vpop.f32.mrb[70].mxu0 }
 0x25c   : > { %v1588_v43 = vadd.f32 %v2453_v6, %v3032_v12  ;;  %v1579_v45 = vpop.f32.mrb[71].mxu0  ;;  %v1645_v10 = vmax.f32 %v1585_v29, 0.0 }
 0x25d   : > { %v1580_v46 = vadd.f32 %v3032_v12, %v1579_v45  ;;  %v1643_v17 = vmax.f32 %v1577_v41, 0.0 }
 0x25e   : > { %v1646_v49 = vmax.f32 %v1588_v43, 0.0 }
 0x25f   : > { %v1644_v50 = vmax.f32 %v1580_v46, 0.0 }
 0x260   : > { %v2150_v37 = vpack.c.bf16 %v1646_v49, %v1645_v10 }
 0x261   : > { %v2145_v19 = vpack.c.bf16 %v1644_v50, %v1643_v17 }
 0x262   : > { %2182 = vst [vmem:[%s3042_s30 + $0x58] sm:$0xff] %v2150_v37  }
 0x263   : > { %2181 = vst [vmem:[%s3042_s30 + $0x50] sm:$0xff] %v2145_v19  }
 0x269   : > { %v2456_v51 = vpop.f32.mrb[72].mxu0 }
 0x26a   : > { %v1601_v53 = vadd.f32 %v2456_v51, %v3032_v12  ;;  %v1592_v40 = vpop.f32.mrb[73].mxu0 }
 0x26b   : > { %v1593_v54 = vadd.f32 %v3032_v12, %v1592_v40  ;;  %v2457_v24 = vpop.f32.mrb[74].mxu0 }
 0x26c   : > { %v1604_v56 = vadd.f32 %v2457_v24, %v3032_v12  ;;  %v1595_v58 = vpop.f32.mrb[75].mxu0  ;;  %v1649_v23 = vmax.f32 %v1601_v53, 0.0 }
 0x26d   : > { %v1596_v62 = vadd.f32 %v3032_v12, %v1595_v58  ;;  %v1647_v57 = vmax.f32 %v1593_v54, 0.0 }
 0x26e   : > { %v1650_v1 = vmax.f32 %v1604_v56, 0.0 }
 0x26f   : > { %v1648_v33 = vmax.f32 %v1596_v62, 0.0 }
 0x270   : > { %v2160_v2 = vpack.c.bf16 %v1650_v1, %v1649_v23 }
 0x271   : > { %v2155_v47 = vpack.c.bf16 %v1648_v33, %v1647_v57 }
 0x272   : > { %2184 = vst [vmem:[%s3042_s30 + $0x68] sm:$0xff] %v2160_v2  }
 0x273   : > { %2183 = vst [vmem:[%s3042_s30 + $0x60] sm:$0xff] %v2155_v47  }
 0x279   : > { %v2460_v3 = vpop.f32.mrb[76].mxu0 }
 0x27a   : > { %v1617_v30 = vadd.f32 %v2460_v3, %v3032_v12  ;;  %v1608_v42 = vpop.f32.mrb[77].mxu0 }
 0x27b   : > { %v1609_v52 = vadd.f32 %v3032_v12, %v1608_v42  ;;  %v2461_v63 = vpop.f32.mrb[78].mxu0 }
 0x27c   : > { %v1620_v8 = vadd.f32 %v2461_v63, %v3032_v12  ;;  %v1611_v9 = vpop.f32.mrb[79].mxu0  ;;  %v1653_v35 = vmax.f32 %v1617_v30, 0.0 }
 0x27d   : > { %v1612_v13 = vadd.f32 %v3032_v12, %v1611_v9  ;;  %v1651_v15 = vmax.f32 %v1609_v52, 0.0 }
 0x27e   : > { %v1654_v14 = vmax.f32 %v1620_v8, 0.0 }
 0x27f   : > { %v1652_v16 = vmax.f32 %v1612_v13, 0.0 }
 0x280   : > { %v2170_v18 = vpack.c.bf16 %v1654_v14, %v1653_v35 }
 0x281   : > { %v2165_v44 = vpack.c.bf16 %v1652_v16, %v1651_v15 }
 0x282   : > { %2186 = vst [vmem:[%s3042_s30 + $0x78] sm:$0xff] %v2170_v18  }
 0x283   : > { %2185 = vst [vmem:[%s3042_s30 + $0x70] sm:$0xff] %v2165_v44  }
 0x284 PF: > { %s14_s17 = sadd.s32 1, %s2654_s17   ;;  %s3102_s15 = smov %s2650_s16 }
 0x285   : > { %p11_p5 = scmp.ge.s32.totalorder %s14_s17, 4   ;;  %s3103_s16 = smov %s3105_s18 }
 0x287   :  { %13 = sbr.rel (!%p11_p5) target bundleno = 2 (0x2), region = 77 }

</bundles_post_ra>
